<compile_context>
chip_gen: v5e
topology: v5e:2x2
jax: 0.10.0
libtpu: 0.0.40
codegen_flags: <defaults>
</compile_context>

<pallas_src>
import numpy as np
import jax
import jax.numpy as jnp
from jax.experimental import pallas as pl
from jax.experimental.pallas import tpu as pltpu

# ---- module hyper-parameters (small shapes consistent with LIFRNN.__init__) ----
ECNUM, CA1NUM, CA3NUM, ACTNUM = 32, 32, 32, 2
LENGTH, DT = 10.0, 0.5
BETA, VTHRESH, VRESET, SIGMA = 0.95, 1.0, -1.0, 5.0
BS = 8
STEPNUM = int(LENGTH / DT)  # = 20

# 1-based step where the sensory cue is injected (PyTorch: `if x == 0.1 * length`).
# Integer-derived, then validated against the exact float-equality test of the original.
_cand = int(round(0.1 * LENGTH / DT))
TRIG_STEP = _cand if (1 <= _cand <= STEPNUM and _cand * DT == 0.1 * LENGTH) else -1


def _lif(v_old, i_in, s_old):
    # Vmem(t) = beta * V(t-1) + I(t) + Vreset * S(t-1)
    # spk(t)  = (V(t-1) - Vthresh > 0)           <- uses the OLD V, as in the torch code
    v_new = BETA * v_old + i_in + VRESET * s_old
    spk = (v_old - VTHRESH > 0).astype(jnp.float32)
    return v_new, spk


def make_lifrnn_kernel(bs, ec5ec3_is_identity):
    """Build the kernel body. The whole time loop is unrolled inside the kernel; state
    lives in vregs (no VMEM scratch round-trips, no grid-step overhead)."""

    def kernel(cue_ref, ca3drive_ref, wec3ca1_ref, wca1ec5_ref, wca1act_ref, *rest):
        if ec5ec3_is_identity:
            (out_ref,) = rest
            wec5ec3 = None
        else:
            wec5ec3_ref, out_ref = rest
            wec5ec3 = wec5ec3_ref[...]

        cue = cue_ref[...]
        wec3ca1 = wec3ca1_ref[...]
        wca1ec5 = wca1ec5_ref[...]

        ec3_v = jnp.full((bs, ECNUM), VRESET, jnp.float32)
        ec5_v = jnp.full((bs, ECNUM), VRESET, jnp.float32)
        ca1_v = jnp.full((bs, CA1NUM), VRESET, jnp.float32)
        ec3_s = jnp.zeros((bs, ECNUM), jnp.float32)
        ec5_s = jnp.zeros((bs, ECNUM), jnp.float32)
        ca1_s = jnp.zeros((bs, CA1NUM), jnp.float32)

        for step in range(STEPNUM):  # fully unrolled; `step` is a compile-time constant
            # --- EC3 ---
            if ec5ec3_is_identity:
                i_ec3 = ec5_s
            else:
                i_ec3 = jnp.dot(ec5_s, wec5ec3, preferred_element_type=jnp.float32)
            if step == TRIG_STEP - 1:          # cue injection folded in at compile time
                i_ec3 = i_ec3 + cue
            ec3_v, ec3_s = _lif(ec3_v, i_ec3, ec3_s)

            # --- CA1 --- (CA3 place-cell drive precomputed in the wrapper; (1, CA1NUM)
            # row broadcasts over the batch)
            i_ca1 = (jnp.dot(ec3_s, wec3ca1, preferred_element_type=jnp.float32)
                     + ca3drive_ref[pl.ds(step, 1), :])
            ca1_v, ca1_s = _lif(ca1_v, i_ca1, ca1_s)

            # --- EC5 ---
            i_ec5 = jnp.dot(ca1_s, wca1ec5, preferred_element_type=jnp.float32)
            ec5_v, ec5_s = _lif(ec5_v, i_ec5, ec5_s)

        # Output projection computed exactly once, from the final CA1 spike train.
        out_ref[...] = jnp.dot(ca1_s, wca1act_ref[...],
                               preferred_element_type=jnp.float32)

    return kernel


def lifrnn_forward(cue, ca3_center, uniforms,
                   Wec3ca1, Wca3ca1, Wca1ec5, Wec5ec3, Wca1act,
                   *, ec5ec3_is_identity=None):
    bs = cue.shape[0]

    # Specialize away the EC5->EC3 matmul when Wec5ec3 is the identity (as hard-coded
    # in the PyTorch module). Falls back to the general dot if it isn't / is abstract.
    if ec5ec3_is_identity is None:
        try:
            ec5ec3_is_identity = bool(np.array_equal(
                np.asarray(Wec5ec3), np.eye(Wec5ec3.shape[0], dtype=np.float32)))
        except Exception:
            ec5ec3_is_identity = False

    # CA3 place-cell drive is independent of the RNN state: precompute all STEPNUM steps
    # at once (one batched matmul, off the kernel's serial dependency chain).
    x = (jnp.arange(1, STEPNUM + 1, dtype=jnp.float32) * DT)[:, None]          # (T, 1)
    ca3fr = jnp.exp(-(((x - ca3_center.reshape(1, CA3NUM)) / SIGMA) ** 2) / 2.0)
    p_spk = 1.0 - jnp.exp(-ca3fr)
    ca3spk = (uniforms < p_spk).astype(jnp.float32)                            # (T, CA3NUM)
    ca3drive = jnp.dot(ca3spk, Wca3ca1, preferred_element_type=jnp.float32)    # (T, CA1NUM)

    args = [cue, ca3drive, Wec3ca1, Wca1ec5, Wca1act]
    if not ec5ec3_is_identity:
        args.append(Wec5ec3)

    vmem_spec = pl.BlockSpec(memory_space=pltpu.MemorySpace.VMEM)
    return pl.pallas_call(
        make_lifrnn_kernel(bs, ec5ec3_is_identity),
        out_shape=jax.ShapeDtypeStruct((bs, ACTNUM), jnp.float32),
        in_specs=[vmem_spec] * len(args),
        out_specs=vmem_spec,
    )(*args)


def lifrnn_ref(cue, ca3_center, uniforms,
               Wec3ca1, Wca3ca1, Wca1ec5, Wec5ec3, Wca1act):
    """Pure-JAX reference mirroring the PyTorch forward exactly (no hoisting)."""
    bs = cue.shape[0]
    ec3 = VRESET * jnp.ones((bs, ECNUM), jnp.float32)
    ec5 = VRESET * jnp.ones((bs, ECNUM), jnp.float32)
    ca1 = VRESET * jnp.ones((bs, CA1NUM), jnp.float32)
    ec3s = jnp.zeros((bs, ECNUM), jnp.float32)
    ec5s = jnp.zeros((bs, ECNUM), jnp.float32)
    ca1s = jnp.zeros((bs, CA1NUM), jnp.float32)
    for step in range(1, STEPNUM + 1):
        x = jnp.float32(step * DT)
        sens = cue if step == TRIG_STEP else 0.0
        ca3fr = jnp.exp(-(((x - ca3_center) / SIGMA) ** 2) / 2.0)
        p = 1.0 - jnp.exp(-ca3fr)
        ca3s = (uniforms[step - 1:step] < p).astype(jnp.float32)
        ec3, ec3s = _lif(ec3, ec5s @ Wec5ec3 + sens, ec3s)
        ca1, ca1s = _lif(ca1, ec3s @ Wec3ca1 + ca3s @ Wca3ca1, ca1s)
        ec5, ec5s = _lif(ec5, ca1s @ Wca1ec5, ec5s)
    return ca1s @ Wca1act


if __name__ == "__main__":
    key = jax.random.PRNGKey(0)
    k_cue, k_u, k1, k2, k3, k4 = jax.random.split(key, 6)

    # Parameters (shapes from LIFRNN.__init__, deterministic synthetic init).
    Wec3ca1 = 0.01 * jax.random.uniform(k1, (ECNUM, CA1NUM), jnp.float32)
    Wca3ca1 = 0.01 * jax.random.uniform(k2, (CA3NUM, CA1NUM), jnp.float32)
    Wca1ec5 = 0.01 * jax.random.normal(k3, (CA1NUM, ECNUM), jnp.float32)
    Wec5ec3 = jnp.eye(ECNUM, dtype=jnp.float32)
    Wca1act = 0.01 * jax.random.uniform(k4, (CA1NUM, ACTNUM), jnp.float32)

    ca3_center = jnp.linspace(0.0, LENGTH, CA3NUM, dtype=jnp.float32).reshape(1, CA3NUM)

    # Inputs: cue (bs, ecnum) and the per-step uniforms driving CA3 Poisson spiking.
    cue = jax.random.normal(k_cue, (BS, ECNUM), jnp.float32)
    uniforms = jax.random.uniform(k_u, (STEPNUM, CA3NUM), jnp.float32)

    out = lifrnn_forward(cue, ca3_center, uniforms,
                         Wec3ca1, Wca3ca1, Wca1ec5, Wec5ec3, Wca1act)
    out = jax.block_until_ready(out)

    ref = lifrnn_ref(cue, ca3_center, uniforms,
                     Wec3ca1, Wca3ca1, Wca1ec5, Wec5ec3, Wca1act)
    ref = jax.block_until_ready(ref)

    assert out.shape == (BS, ACTNUM)
    assert np.all(np.isfinite(np.asarray(out)))
    assert np.allclose(np.asarray(out), np.asarray(ref), rtol=1e-4, atol=1e-4), (out, ref)

    # Also exercise the general (non-identity) EC5->EC3 matmul path once.
    out_gen = jax.block_until_ready(
        lifrnn_forward(cue, ca3_center, uniforms,
                       Wec3ca1, Wca3ca1, Wca1ec5, Wec5ec3, Wca1act,
                       ec5ec3_is_identity=False))
    assert np.allclose(np.asarray(out_gen), np.asarray(ref), rtol=1e-4, atol=1e-4)

    print("KERNEL_OK")
</pallas_src>

<mosaic_0001>
module attributes {stable_mosaic.version = 11 : i64} {
  func.func @kernel(%arg0: memref<8x32xf32, #tpu.memory_space<vmem>>, %arg1: memref<20x32xf32, #tpu.memory_space<vmem>>, %arg2: memref<32x32xf32, #tpu.memory_space<vmem>>, %arg3: memref<32x32xf32, #tpu.memory_space<vmem>>, %arg4: memref<32x2xf32, #tpu.memory_space<vmem>>, %arg5: memref<8x2xf32, #tpu.memory_space<vmem>>) attributes {dimension_semantics = [], scalar_prefetch = 0 : i64, scratch_operands = 0 : i64, tpu.core_type = #tpu.core_type<tc>} {
    %c0 = arith.constant 0 : index
    %c0_0 = arith.constant 0 : index
    %0 = vector.load %arg0[%c0, %c0_0] : memref<8x32xf32, #tpu.memory_space<vmem>>, vector<8x32xf32>
    %c0_1 = arith.constant 0 : index
    %c0_2 = arith.constant 0 : index
    %1 = vector.load %arg2[%c0_1, %c0_2] : memref<32x32xf32, #tpu.memory_space<vmem>>, vector<32x32xf32>
    %c0_3 = arith.constant 0 : index
    %c0_4 = arith.constant 0 : index
    %2 = vector.load %arg3[%c0_3, %c0_4] : memref<32x32xf32, #tpu.memory_space<vmem>>, vector<32x32xf32>
    %cst = arith.constant -1.000000e+00 : f32
    %3 = vector.broadcast %cst : f32 to vector<8x32xf32>
    %cst_5 = arith.constant -1.000000e+00 : f32
    %4 = vector.broadcast %cst_5 : f32 to vector<8x32xf32>
    %cst_6 = arith.constant -1.000000e+00 : f32
    %5 = vector.broadcast %cst_6 : f32 to vector<8x32xf32>
    %cst_7 = arith.constant 0.000000e+00 : f32
    %6 = vector.broadcast %cst_7 : f32 to vector<8x32xf32>
    %cst_8 = arith.constant 0.000000e+00 : f32
    %7 = vector.broadcast %cst_8 : f32 to vector<8x32xf32>
    %cst_9 = arith.constant 0.000000e+00 : f32
    %8 = vector.broadcast %cst_9 : f32 to vector<8x32xf32>
    %cst_10 = arith.constant 0.949999988 : f32
    %9 = vector.broadcast %cst_10 : f32 to vector<8x32xf32>
    %10 = arith.mulf %9, %3 : vector<8x32xf32>
    %11 = arith.addf %10, %7 : vector<8x32xf32>
    %cst_11 = arith.constant -1.000000e+00 : f32
    %12 = vector.broadcast %cst_11 : f32 to vector<8x32xf32>
    %13 = arith.mulf %12, %6 : vector<8x32xf32>
    %14 = arith.addf %11, %13 : vector<8x32xf32>
    %cst_12 = arith.constant 1.000000e+00 : f32
    %15 = vector.broadcast %cst_12 : f32 to vector<8x32xf32>
    %16 = arith.subf %3, %15 : vector<8x32xf32>
    %cst_13 = arith.constant 0.000000e+00 : f32
    %17 = vector.broadcast %cst_13 : f32 to vector<8x32xf32>
    %18 = arith.cmpf ogt, %16, %17 : vector<8x32xf32>
    %19 = arith.extui %18 : vector<8x32xi1> to vector<8x32xi32>
    %20 = arith.sitofp %19 : vector<8x32xi32> to vector<8x32xf32>
    %cst_14 = arith.constant dense<0.000000e+00> : vector<8x32xf32>
    %21 = tpu.matmul %20, %1, %cst_14 {dimension_numbers = #tpu.dot_dimension_numbers<[1], [0], [0], [1], [0, 0, 1, 1], [], []>} : vector<8x32xf32>, vector<32x32xf32>, vector<8x32xf32> -> vector<8x32xf32>
    %c0_15 = arith.constant 0 : index
    %c0_16 = arith.constant 0 : index
    %22 = vector.load %arg1[%c0_15, %c0_16] : memref<20x32xf32, #tpu.memory_space<vmem>>, vector<1x32xf32>
    %23 = vector.broadcast %22 : vector<1x32xf32> to vector<8x32xf32>
    %24 = arith.addf %21, %23 : vector<8x32xf32>
    %cst_17 = arith.constant 0.949999988 : f32
    %25 = vector.broadcast %cst_17 : f32 to vector<8x32xf32>
    %26 = arith.mulf %25, %5 : vector<8x32xf32>
    %27 = arith.addf %26, %24 : vector<8x32xf32>
    %cst_18 = arith.constant -1.000000e+00 : f32
    %28 = vector.broadcast %cst_18 : f32 to vector<8x32xf32>
    %29 = arith.mulf %28, %8 : vector<8x32xf32>
    %30 = arith.addf %27, %29 : vector<8x32xf32>
    %cst_19 = arith.constant 1.000000e+00 : f32
    %31 = vector.broadcast %cst_19 : f32 to vector<8x32xf32>
    %32 = arith.subf %5, %31 : vector<8x32xf32>
    %cst_20 = arith.constant 0.000000e+00 : f32
    %33 = vector.broadcast %cst_20 : f32 to vector<8x32xf32>
    %34 = arith.cmpf ogt, %32, %33 : vector<8x32xf32>
    %35 = arith.extui %34 : vector<8x32xi1> to vector<8x32xi32>
    %36 = arith.sitofp %35 : vector<8x32xi32> to vector<8x32xf32>
    %cst_21 = arith.constant dense<0.000000e+00> : vector<8x32xf32>
    %37 = tpu.matmul %36, %2, %cst_21 {dimension_numbers = #tpu.dot_dimension_numbers<[1], [0], [0], [1], [0, 0, 1, 1], [], []>} : vector<8x32xf32>, vector<32x32xf32>, vector<8x32xf32> -> vector<8x32xf32>
    %cst_22 = arith.constant 0.949999988 : f32
    %38 = vector.broadcast %cst_22 : f32 to vector<8x32xf32>
    %39 = arith.mulf %38, %4 : vector<8x32xf32>
    %40 = arith.addf %39, %37 : vector<8x32xf32>
    %cst_23 = arith.constant -1.000000e+00 : f32
    %41 = vector.broadcast %cst_23 : f32 to vector<8x32xf32>
    %42 = arith.mulf %41, %7 : vector<8x32xf32>
    %43 = arith.addf %40, %42 : vector<8x32xf32>
    %cst_24 = arith.constant 1.000000e+00 : f32
    %44 = vector.broadcast %cst_24 : f32 to vector<8x32xf32>
    %45 = arith.subf %4, %44 : vector<8x32xf32>
    %cst_25 = arith.constant 0.000000e+00 : f32
    %46 = vector.broadcast %cst_25 : f32 to vector<8x32xf32>
    %47 = arith.cmpf ogt, %45, %46 : vector<8x32xf32>
    %48 = arith.extui %47 : vector<8x32xi1> to vector<8x32xi32>
    %49 = arith.sitofp %48 : vector<8x32xi32> to vector<8x32xf32>
    %50 = arith.addf %49, %0 : vector<8x32xf32>
    %cst_26 = arith.constant 0.949999988 : f32
    %51 = vector.broadcast %cst_26 : f32 to vector<8x32xf32>
    %52 = arith.mulf %51, %14 : vector<8x32xf32>
    %53 = arith.addf %52, %50 : vector<8x32xf32>
    %cst_27 = arith.constant -1.000000e+00 : f32
    %54 = vector.broadcast %cst_27 : f32 to vector<8x32xf32>
    %55 = arith.mulf %54, %20 : vector<8x32xf32>
    %56 = arith.addf %53, %55 : vector<8x32xf32>
    %cst_28 = arith.constant 1.000000e+00 : f32
    %57 = vector.broadcast %cst_28 : f32 to vector<8x32xf32>
    %58 = arith.subf %14, %57 : vector<8x32xf32>
    %cst_29 = arith.constant 0.000000e+00 : f32
    %59 = vector.broadcast %cst_29 : f32 to vector<8x32xf32>
    %60 = arith.cmpf ogt, %58, %59 : vector<8x32xf32>
    %61 = arith.extui %60 : vector<8x32xi1> to vector<8x32xi32>
    %62 = arith.sitofp %61 : vector<8x32xi32> to vector<8x32xf32>
    %cst_30 = arith.constant dense<0.000000e+00> : vector<8x32xf32>
    %63 = tpu.matmul %62, %1, %cst_30 {dimension_numbers = #tpu.dot_dimension_numbers<[1], [0], [0], [1], [0, 0, 1, 1], [], []>} : vector<8x32xf32>, vector<32x32xf32>, vector<8x32xf32> -> vector<8x32xf32>
    %c1 = arith.constant 1 : index
    %c0_31 = arith.constant 0 : index
    %64 = vector.load %arg1[%c1, %c0_31] : memref<20x32xf32, #tpu.memory_space<vmem>>, vector<1x32xf32>
    %65 = vector.broadcast %64 : vector<1x32xf32> to vector<8x32xf32>
    %66 = arith.addf %63, %65 : vector<8x32xf32>
    %cst_32 = arith.constant 0.949999988 : f32
    %67 = vector.broadcast %cst_32 : f32 to vector<8x32xf32>
    %68 = arith.mulf %67, %30 : vector<8x32xf32>
    %69 = arith.addf %68, %66 : vector<8x32xf32>
    %cst_33 = arith.constant -1.000000e+00 : f32
    %70 = vector.broadcast %cst_33 : f32 to vector<8x32xf32>
    %71 = arith.mulf %70, %36 : vector<8x32xf32>
    %72 = arith.addf %69, %71 : vector<8x32xf32>
    %cst_34 = arith.constant 1.000000e+00 : f32
    %73 = vector.broadcast %cst_34 : f32 to vector<8x32xf32>
    %74 = arith.subf %30, %73 : vector<8x32xf32>
    %cst_35 = arith.constant 0.000000e+00 : f32
    %75 = vector.broadcast %cst_35 : f32 to vector<8x32xf32>
    %76 = arith.cmpf ogt, %74, %75 : vector<8x32xf32>
    %77 = arith.extui %76 : vector<8x32xi1> to vector<8x32xi32>
    %78 = arith.sitofp %77 : vector<8x32xi32> to vector<8x32xf32>
    %cst_36 = arith.constant dense<0.000000e+00> : vector<8x32xf32>
    %79 = tpu.matmul %78, %2, %cst_36 {dimension_numbers = #tpu.dot_dimension_numbers<[1], [0], [0], [1], [0, 0, 1, 1], [], []>} : vector<8x32xf32>, vector<32x32xf32>, vector<8x32xf32> -> vector<8x32xf32>
    %cst_37 = arith.constant 0.949999988 : f32
    %80 = vector.broadcast %cst_37 : f32 to vector<8x32xf32>
    %81 = arith.mulf %80, %43 : vector<8x32xf32>
    %82 = arith.addf %81, %79 : vector<8x32xf32>
    %cst_38 = arith.constant -1.000000e+00 : f32
    %83 = vector.broadcast %cst_38 : f32 to vector<8x32xf32>
    %84 = arith.mulf %83, %49 : vector<8x32xf32>
    %85 = arith.addf %82, %84 : vector<8x32xf32>
    %cst_39 = arith.constant 1.000000e+00 : f32
    %86 = vector.broadcast %cst_39 : f32 to vector<8x32xf32>
    %87 = arith.subf %43, %86 : vector<8x32xf32>
    %cst_40 = arith.constant 0.000000e+00 : f32
    %88 = vector.broadcast %cst_40 : f32 to vector<8x32xf32>
    %89 = arith.cmpf ogt, %87, %88 : vector<8x32xf32>
    %90 = arith.extui %89 : vector<8x32xi1> to vector<8x32xi32>
    %91 = arith.sitofp %90 : vector<8x32xi32> to vector<8x32xf32>
    %cst_41 = arith.constant 0.949999988 : f32
    %92 = vector.broadcast %cst_41 : f32 to vector<8x32xf32>
    %93 = arith.mulf %92, %56 : vector<8x32xf32>
    %94 = arith.addf %93, %91 : vector<8x32xf32>
    %cst_42 = arith.constant -1.000000e+00 : f32
    %95 = vector.broadcast %cst_42 : f32 to vector<8x32xf32>
    %96 = arith.mulf %95, %62 : vector<8x32xf32>
    %97 = arith.addf %94, %96 : vector<8x32xf32>
    %cst_43 = arith.constant 1.000000e+00 : f32
    %98 = vector.broadcast %cst_43 : f32 to vector<8x32xf32>
    %99 = arith.subf %56, %98 : vector<8x32xf32>
    %cst_44 = arith.constant 0.000000e+00 : f32
    %100 = vector.broadcast %cst_44 : f32 to vector<8x32xf32>
    %101 = arith.cmpf ogt, %99, %100 : vector<8x32xf32>
    %102 = arith.extui %101 : vector<8x32xi1> to vector<8x32xi32>
    %103 = arith.sitofp %102 : vector<8x32xi32> to vector<8x32xf32>
    %cst_45 = arith.constant dense<0.000000e+00> : vector<8x32xf32>
    %104 = tpu.matmul %103, %1, %cst_45 {dimension_numbers = #tpu.dot_dimension_numbers<[1], [0], [0], [1], [0, 0, 1, 1], [], []>} : vector<8x32xf32>, vector<32x32xf32>, vector<8x32xf32> -> vector<8x32xf32>
    %c2 = arith.constant 2 : index
    %c0_46 = arith.constant 0 : index
    %105 = vector.load %arg1[%c2, %c0_46] : memref<20x32xf32, #tpu.memory_space<vmem>>, vector<1x32xf32>
    %106 = vector.broadcast %105 : vector<1x32xf32> to vector<8x32xf32>
    %107 = arith.addf %104, %106 : vector<8x32xf32>
    %cst_47 = arith.constant 0.949999988 : f32
    %108 = vector.broadcast %cst_47 : f32 to vector<8x32xf32>
    %109 = arith.mulf %108, %72 : vector<8x32xf32>
    %110 = arith.addf %109, %107 : vector<8x32xf32>
    %cst_48 = arith.constant -1.000000e+00 : f32
    %111 = vector.broadcast %cst_48 : f32 to vector<8x32xf32>
    %112 = arith.mulf %111, %78 : vector<8x32xf32>
    %113 = arith.addf %110, %112 : vector<8x32xf32>
    %cst_49 = arith.constant 1.000000e+00 : f32
    %114 = vector.broadcast %cst_49 : f32 to vector<8x32xf32>
    %115 = arith.subf %72, %114 : vector<8x32xf32>
    %cst_50 = arith.constant 0.000000e+00 : f32
    %116 = vector.broadcast %cst_50 : f32 to vector<8x32xf32>
    %117 = arith.cmpf ogt, %115, %116 : vector<8x32xf32>
    %118 = arith.extui %117 : vector<8x32xi1> to vector<8x32xi32>
    %119 = arith.sitofp %118 : vector<8x32xi32> to vector<8x32xf32>
    %cst_51 = arith.constant dense<0.000000e+00> : vector<8x32xf32>
    %120 = tpu.matmul %119, %2, %cst_51 {dimension_numbers = #tpu.dot_dimension_numbers<[1], [0], [0], [1], [0, 0, 1, 1], [], []>} : vector<8x32xf32>, vector<32x32xf32>, vector<8x32xf32> -> vector<8x32xf32>
    %cst_52 = arith.constant 0.949999988 : f32
    %121 = vector.broadcast %cst_52 : f32 to vector<8x32xf32>
    %122 = arith.mulf %121, %85 : vector<8x32xf32>
    %123 = arith.addf %122, %120 : vector<8x32xf32>
    %cst_53 = arith.constant -1.000000e+00 : f32
    %124 = vector.broadcast %cst_53 : f32 to vector<8x32xf32>
    %125 = arith.mulf %124, %91 : vector<8x32xf32>
    %126 = arith.addf %123, %125 : vector<8x32xf32>
    %cst_54 = arith.constant 1.000000e+00 : f32
    %127 = vector.broadcast %cst_54 : f32 to vector<8x32xf32>
    %128 = arith.subf %85, %127 : vector<8x32xf32>
    %cst_55 = arith.constant 0.000000e+00 : f32
    %129 = vector.broadcast %cst_55 : f32 to vector<8x32xf32>
    %130 = arith.cmpf ogt, %128, %129 : vector<8x32xf32>
    %131 = arith.extui %130 : vector<8x32xi1> to vector<8x32xi32>
    %132 = arith.sitofp %131 : vector<8x32xi32> to vector<8x32xf32>
    %cst_56 = arith.constant 0.949999988 : f32
    %133 = vector.broadcast %cst_56 : f32 to vector<8x32xf32>
    %134 = arith.mulf %133, %97 : vector<8x32xf32>
    %135 = arith.addf %134, %132 : vector<8x32xf32>
    %cst_57 = arith.constant -1.000000e+00 : f32
    %136 = vector.broadcast %cst_57 : f32 to vector<8x32xf32>
    %137 = arith.mulf %136, %103 : vector<8x32xf32>
    %138 = arith.addf %135, %137 : vector<8x32xf32>
    %cst_58 = arith.constant 1.000000e+00 : f32
    %139 = vector.broadcast %cst_58 : f32 to vector<8x32xf32>
    %140 = arith.subf %97, %139 : vector<8x32xf32>
    %cst_59 = arith.constant 0.000000e+00 : f32
    %141 = vector.broadcast %cst_59 : f32 to vector<8x32xf32>
    %142 = arith.cmpf ogt, %140, %141 : vector<8x32xf32>
    %143 = arith.extui %142 : vector<8x32xi1> to vector<8x32xi32>
    %144 = arith.sitofp %143 : vector<8x32xi32> to vector<8x32xf32>
    %cst_60 = arith.constant dense<0.000000e+00> : vector<8x32xf32>
    %145 = tpu.matmul %144, %1, %cst_60 {dimension_numbers = #tpu.dot_dimension_numbers<[1], [0], [0], [1], [0, 0, 1, 1], [], []>} : vector<8x32xf32>, vector<32x32xf32>, vector<8x32xf32> -> vector<8x32xf32>
    %c3 = arith.constant 3 : index
    %c0_61 = arith.constant 0 : index
    %146 = vector.load %arg1[%c3, %c0_61] : memref<20x32xf32, #tpu.memory_space<vmem>>, vector<1x32xf32>
    %147 = vector.broadcast %146 : vector<1x32xf32> to vector<8x32xf32>
    %148 = arith.addf %145, %147 : vector<8x32xf32>
    %cst_62 = arith.constant 0.949999988 : f32
    %149 = vector.broadcast %cst_62 : f32 to vector<8x32xf32>
    %150 = arith.mulf %149, %113 : vector<8x32xf32>
    %151 = arith.addf %150, %148 : vector<8x32xf32>
    %cst_63 = arith.constant -1.000000e+00 : f32
    %152 = vector.broadcast %cst_63 : f32 to vector<8x32xf32>
    %153 = arith.mulf %152, %119 : vector<8x32xf32>
    %154 = arith.addf %151, %153 : vector<8x32xf32>
    %cst_64 = arith.constant 1.000000e+00 : f32
    %155 = vector.broadcast %cst_64 : f32 to vector<8x32xf32>
    %156 = arith.subf %113, %155 : vector<8x32xf32>
    %cst_65 = arith.constant 0.000000e+00 : f32
    %157 = vector.broadcast %cst_65 : f32 to vector<8x32xf32>
    %158 = arith.cmpf ogt, %156, %157 : vector<8x32xf32>
    %159 = arith.extui %158 : vector<8x32xi1> to vector<8x32xi32>
    %160 = arith.sitofp %159 : vector<8x32xi32> to vector<8x32xf32>
    %cst_66 = arith.constant dense<0.000000e+00> : vector<8x32xf32>
    %161 = tpu.matmul %160, %2, %cst_66 {dimension_numbers = #tpu.dot_dimension_numbers<[1], [0], [0], [1], [0, 0, 1, 1], [], []>} : vector<8x32xf32>, vector<32x32xf32>, vector<8x32xf32> -> vector<8x32xf32>
    %cst_67 = arith.constant 0.949999988 : f32
    %162 = vector.broadcast %cst_67 : f32 to vector<8x32xf32>
    %163 = arith.mulf %162, %126 : vector<8x32xf32>
    %164 = arith.addf %163, %161 : vector<8x32xf32>
    %cst_68 = arith.constant -1.000000e+00 : f32
    %165 = vector.broadcast %cst_68 : f32 to vector<8x32xf32>
    %166 = arith.mulf %165, %132 : vector<8x32xf32>
    %167 = arith.addf %164, %166 : vector<8x32xf32>
    %cst_69 = arith.constant 1.000000e+00 : f32
    %168 = vector.broadcast %cst_69 : f32 to vector<8x32xf32>
    %169 = arith.subf %126, %168 : vector<8x32xf32>
    %cst_70 = arith.constant 0.000000e+00 : f32
    %170 = vector.broadcast %cst_70 : f32 to vector<8x32xf32>
    %171 = arith.cmpf ogt, %169, %170 : vector<8x32xf32>
    %172 = arith.extui %171 : vector<8x32xi1> to vector<8x32xi32>
    %173 = arith.sitofp %172 : vector<8x32xi32> to vector<8x32xf32>
    %cst_71 = arith.constant 0.949999988 : f32
    %174 = vector.broadcast %cst_71 : f32 to vector<8x32xf32>
    %175 = arith.mulf %174, %138 : vector<8x32xf32>
    %176 = arith.addf %175, %173 : vector<8x32xf32>
    %cst_72 = arith.constant -1.000000e+00 : f32
    %177 = vector.broadcast %cst_72 : f32 to vector<8x32xf32>
    %178 = arith.mulf %177, %144 : vector<8x32xf32>
    %179 = arith.addf %176, %178 : vector<8x32xf32>
    %cst_73 = arith.constant 1.000000e+00 : f32
    %180 = vector.broadcast %cst_73 : f32 to vector<8x32xf32>
    %181 = arith.subf %138, %180 : vector<8x32xf32>
    %cst_74 = arith.constant 0.000000e+00 : f32
    %182 = vector.broadcast %cst_74 : f32 to vector<8x32xf32>
    %183 = arith.cmpf ogt, %181, %182 : vector<8x32xf32>
    %184 = arith.extui %183 : vector<8x32xi1> to vector<8x32xi32>
    %185 = arith.sitofp %184 : vector<8x32xi32> to vector<8x32xf32>
    %cst_75 = arith.constant dense<0.000000e+00> : vector<8x32xf32>
    %186 = tpu.matmul %185, %1, %cst_75 {dimension_numbers = #tpu.dot_dimension_numbers<[1], [0], [0], [1], [0, 0, 1, 1], [], []>} : vector<8x32xf32>, vector<32x32xf32>, vector<8x32xf32> -> vector<8x32xf32>
    %c4 = arith.constant 4 : index
    %c0_76 = arith.constant 0 : index
    %187 = vector.load %arg1[%c4, %c0_76] : memref<20x32xf32, #tpu.memory_space<vmem>>, vector<1x32xf32>
    %188 = vector.broadcast %187 : vector<1x32xf32> to vector<8x32xf32>
    %189 = arith.addf %186, %188 : vector<8x32xf32>
    %cst_77 = arith.constant 0.949999988 : f32
    %190 = vector.broadcast %cst_77 : f32 to vector<8x32xf32>
    %191 = arith.mulf %190, %154 : vector<8x32xf32>
    %192 = arith.addf %191, %189 : vector<8x32xf32>
    %cst_78 = arith.constant -1.000000e+00 : f32
    %193 = vector.broadcast %cst_78 : f32 to vector<8x32xf32>
    %194 = arith.mulf %193, %160 : vector<8x32xf32>
    %195 = arith.addf %192, %194 : vector<8x32xf32>
    %cst_79 = arith.constant 1.000000e+00 : f32
    %196 = vector.broadcast %cst_79 : f32 to vector<8x32xf32>
    %197 = arith.subf %154, %196 : vector<8x32xf32>
    %cst_80 = arith.constant 0.000000e+00 : f32
    %198 = vector.broadcast %cst_80 : f32 to vector<8x32xf32>
    %199 = arith.cmpf ogt, %197, %198 : vector<8x32xf32>
    %200 = arith.extui %199 : vector<8x32xi1> to vector<8x32xi32>
    %201 = arith.sitofp %200 : vector<8x32xi32> to vector<8x32xf32>
    %cst_81 = arith.constant dense<0.000000e+00> : vector<8x32xf32>
    %202 = tpu.matmul %201, %2, %cst_81 {dimension_numbers = #tpu.dot_dimension_numbers<[1], [0], [0], [1], [0, 0, 1, 1], [], []>} : vector<8x32xf32>, vector<32x32xf32>, vector<8x32xf32> -> vector<8x32xf32>
    %cst_82 = arith.constant 0.949999988 : f32
    %203 = vector.broadcast %cst_82 : f32 to vector<8x32xf32>
    %204 = arith.mulf %203, %167 : vector<8x32xf32>
    %205 = arith.addf %204, %202 : vector<8x32xf32>
    %cst_83 = arith.constant -1.000000e+00 : f32
    %206 = vector.broadcast %cst_83 : f32 to vector<8x32xf32>
    %207 = arith.mulf %206, %173 : vector<8x32xf32>
    %208 = arith.addf %205, %207 : vector<8x32xf32>
    %cst_84 = arith.constant 1.000000e+00 : f32
    %209 = vector.broadcast %cst_84 : f32 to vector<8x32xf32>
    %210 = arith.subf %167, %209 : vector<8x32xf32>
    %cst_85 = arith.constant 0.000000e+00 : f32
    %211 = vector.broadcast %cst_85 : f32 to vector<8x32xf32>
    %212 = arith.cmpf ogt, %210, %211 : vector<8x32xf32>
    %213 = arith.extui %212 : vector<8x32xi1> to vector<8x32xi32>
    %214 = arith.sitofp %213 : vector<8x32xi32> to vector<8x32xf32>
    %cst_86 = arith.constant 0.949999988 : f32
    %215 = vector.broadcast %cst_86 : f32 to vector<8x32xf32>
    %216 = arith.mulf %215, %179 : vector<8x32xf32>
    %217 = arith.addf %216, %214 : vector<8x32xf32>
    %cst_87 = arith.constant -1.000000e+00 : f32
    %218 = vector.broadcast %cst_87 : f32 to vector<8x32xf32>
    %219 = arith.mulf %218, %185 : vector<8x32xf32>
    %220 = arith.addf %217, %219 : vector<8x32xf32>
    %cst_88 = arith.constant 1.000000e+00 : f32
    %221 = vector.broadcast %cst_88 : f32 to vector<8x32xf32>
    %222 = arith.subf %179, %221 : vector<8x32xf32>
    %cst_89 = arith.constant 0.000000e+00 : f32
    %223 = vector.broadcast %cst_89 : f32 to vector<8x32xf32>
    %224 = arith.cmpf ogt, %222, %223 : vector<8x32xf32>
    %225 = arith.extui %224 : vector<8x32xi1> to vector<8x32xi32>
    %226 = arith.sitofp %225 : vector<8x32xi32> to vector<8x32xf32>
    %cst_90 = arith.constant dense<0.000000e+00> : vector<8x32xf32>
    %227 = tpu.matmul %226, %1, %cst_90 {dimension_numbers = #tpu.dot_dimension_numbers<[1], [0], [0], [1], [0, 0, 1, 1], [], []>} : vector<8x32xf32>, vector<32x32xf32>, vector<8x32xf32> -> vector<8x32xf32>
    %c5 = arith.constant 5 : index
    %c0_91 = arith.constant 0 : index
    %228 = vector.load %arg1[%c5, %c0_91] : memref<20x32xf32, #tpu.memory_space<vmem>>, vector<1x32xf32>
    %229 = vector.broadcast %228 : vector<1x32xf32> to vector<8x32xf32>
    %230 = arith.addf %227, %229 : vector<8x32xf32>
    %cst_92 = arith.constant 0.949999988 : f32
    %231 = vector.broadcast %cst_92 : f32 to vector<8x32xf32>
    %232 = arith.mulf %231, %195 : vector<8x32xf32>
    %233 = arith.addf %232, %230 : vector<8x32xf32>
    %cst_93 = arith.constant -1.000000e+00 : f32
    %234 = vector.broadcast %cst_93 : f32 to vector<8x32xf32>
    %235 = arith.mulf %234, %201 : vector<8x32xf32>
    %236 = arith.addf %233, %235 : vector<8x32xf32>
    %cst_94 = arith.constant 1.000000e+00 : f32
    %237 = vector.broadcast %cst_94 : f32 to vector<8x32xf32>
    %238 = arith.subf %195, %237 : vector<8x32xf32>
    %cst_95 = arith.constant 0.000000e+00 : f32
    %239 = vector.broadcast %cst_95 : f32 to vector<8x32xf32>
    %240 = arith.cmpf ogt, %238, %239 : vector<8x32xf32>
    %241 = arith.extui %240 : vector<8x32xi1> to vector<8x32xi32>
    %242 = arith.sitofp %241 : vector<8x32xi32> to vector<8x32xf32>
    %cst_96 = arith.constant dense<0.000000e+00> : vector<8x32xf32>
    %243 = tpu.matmul %242, %2, %cst_96 {dimension_numbers = #tpu.dot_dimension_numbers<[1], [0], [0], [1], [0, 0, 1, 1], [], []>} : vector<8x32xf32>, vector<32x32xf32>, vector<8x32xf32> -> vector<8x32xf32>
    %cst_97 = arith.constant 0.949999988 : f32
    %244 = vector.broadcast %cst_97 : f32 to vector<8x32xf32>
    %245 = arith.mulf %244, %208 : vector<8x32xf32>
    %246 = arith.addf %245, %243 : vector<8x32xf32>
    %cst_98 = arith.constant -1.000000e+00 : f32
    %247 = vector.broadcast %cst_98 : f32 to vector<8x32xf32>
    %248 = arith.mulf %247, %214 : vector<8x32xf32>
    %249 = arith.addf %246, %248 : vector<8x32xf32>
    %cst_99 = arith.constant 1.000000e+00 : f32
    %250 = vector.broadcast %cst_99 : f32 to vector<8x32xf32>
    %251 = arith.subf %208, %250 : vector<8x32xf32>
    %cst_100 = arith.constant 0.000000e+00 : f32
    %252 = vector.broadcast %cst_100 : f32 to vector<8x32xf32>
    %253 = arith.cmpf ogt, %251, %252 : vector<8x32xf32>
    %254 = arith.extui %253 : vector<8x32xi1> to vector<8x32xi32>
    %255 = arith.sitofp %254 : vector<8x32xi32> to vector<8x32xf32>
    %cst_101 = arith.constant 0.949999988 : f32
    %256 = vector.broadcast %cst_101 : f32 to vector<8x32xf32>
    %257 = arith.mulf %256, %220 : vector<8x32xf32>
    %258 = arith.addf %257, %255 : vector<8x32xf32>
    %cst_102 = arith.constant -1.000000e+00 : f32
    %259 = vector.broadcast %cst_102 : f32 to vector<8x32xf32>
    %260 = arith.mulf %259, %226 : vector<8x32xf32>
    %261 = arith.addf %258, %260 : vector<8x32xf32>
    %cst_103 = arith.constant 1.000000e+00 : f32
    %262 = vector.broadcast %cst_103 : f32 to vector<8x32xf32>
    %263 = arith.subf %220, %262 : vector<8x32xf32>
    %cst_104 = arith.constant 0.000000e+00 : f32
    %264 = vector.broadcast %cst_104 : f32 to vector<8x32xf32>
    %265 = arith.cmpf ogt, %263, %264 : vector<8x32xf32>
    %266 = arith.extui %265 : vector<8x32xi1> to vector<8x32xi32>
    %267 = arith.sitofp %266 : vector<8x32xi32> to vector<8x32xf32>
    %cst_105 = arith.constant dense<0.000000e+00> : vector<8x32xf32>
    %268 = tpu.matmul %267, %1, %cst_105 {dimension_numbers = #tpu.dot_dimension_numbers<[1], [0], [0], [1], [0, 0, 1, 1], [], []>} : vector<8x32xf32>, vector<32x32xf32>, vector<8x32xf32> -> vector<8x32xf32>
    %c6 = arith.constant 6 : index
    %c0_106 = arith.constant 0 : index
    %269 = vector.load %arg1[%c6, %c0_106] : memref<20x32xf32, #tpu.memory_space<vmem>>, vector<1x32xf32>
    %270 = vector.broadcast %269 : vector<1x32xf32> to vector<8x32xf32>
    %271 = arith.addf %268, %270 : vector<8x32xf32>
    %cst_107 = arith.constant 0.949999988 : f32
    %272 = vector.broadcast %cst_107 : f32 to vector<8x32xf32>
    %273 = arith.mulf %272, %236 : vector<8x32xf32>
    %274 = arith.addf %273, %271 : vector<8x32xf32>
    %cst_108 = arith.constant -1.000000e+00 : f32
    %275 = vector.broadcast %cst_108 : f32 to vector<8x32xf32>
    %276 = arith.mulf %275, %242 : vector<8x32xf32>
    %277 = arith.addf %274, %276 : vector<8x32xf32>
    %cst_109 = arith.constant 1.000000e+00 : f32
    %278 = vector.broadcast %cst_109 : f32 to vector<8x32xf32>
    %279 = arith.subf %236, %278 : vector<8x32xf32>
    %cst_110 = arith.constant 0.000000e+00 : f32
    %280 = vector.broadcast %cst_110 : f32 to vector<8x32xf32>
    %281 = arith.cmpf ogt, %279, %280 : vector<8x32xf32>
    %282 = arith.extui %281 : vector<8x32xi1> to vector<8x32xi32>
    %283 = arith.sitofp %282 : vector<8x32xi32> to vector<8x32xf32>
    %cst_111 = arith.constant dense<0.000000e+00> : vector<8x32xf32>
    %284 = tpu.matmul %283, %2, %cst_111 {dimension_numbers = #tpu.dot_dimension_numbers<[1], [0], [0], [1], [0, 0, 1, 1], [], []>} : vector<8x32xf32>, vector<32x32xf32>, vector<8x32xf32> -> vector<8x32xf32>
    %cst_112 = arith.constant 0.949999988 : f32
    %285 = vector.broadcast %cst_112 : f32 to vector<8x32xf32>
    %286 = arith.mulf %285, %249 : vector<8x32xf32>
    %287 = arith.addf %286, %284 : vector<8x32xf32>
    %cst_113 = arith.constant -1.000000e+00 : f32
    %288 = vector.broadcast %cst_113 : f32 to vector<8x32xf32>
    %289 = arith.mulf %288, %255 : vector<8x32xf32>
    %290 = arith.addf %287, %289 : vector<8x32xf32>
    %cst_114 = arith.constant 1.000000e+00 : f32
    %291 = vector.broadcast %cst_114 : f32 to vector<8x32xf32>
    %292 = arith.subf %249, %291 : vector<8x32xf32>
    %cst_115 = arith.constant 0.000000e+00 : f32
    %293 = vector.broadcast %cst_115 : f32 to vector<8x32xf32>
    %294 = arith.cmpf ogt, %292, %293 : vector<8x32xf32>
    %295 = arith.extui %294 : vector<8x32xi1> to vector<8x32xi32>
    %296 = arith.sitofp %295 : vector<8x32xi32> to vector<8x32xf32>
    %cst_116 = arith.constant 0.949999988 : f32
    %297 = vector.broadcast %cst_116 : f32 to vector<8x32xf32>
    %298 = arith.mulf %297, %261 : vector<8x32xf32>
    %299 = arith.addf %298, %296 : vector<8x32xf32>
    %cst_117 = arith.constant -1.000000e+00 : f32
    %300 = vector.broadcast %cst_117 : f32 to vector<8x32xf32>
    %301 = arith.mulf %300, %267 : vector<8x32xf32>
    %302 = arith.addf %299, %301 : vector<8x32xf32>
    %cst_118 = arith.constant 1.000000e+00 : f32
    %303 = vector.broadcast %cst_118 : f32 to vector<8x32xf32>
    %304 = arith.subf %261, %303 : vector<8x32xf32>
    %cst_119 = arith.constant 0.000000e+00 : f32
    %305 = vector.broadcast %cst_119 : f32 to vector<8x32xf32>
    %306 = arith.cmpf ogt, %304, %305 : vector<8x32xf32>
    %307 = arith.extui %306 : vector<8x32xi1> to vector<8x32xi32>
    %308 = arith.sitofp %307 : vector<8x32xi32> to vector<8x32xf32>
    %cst_120 = arith.constant dense<0.000000e+00> : vector<8x32xf32>
    %309 = tpu.matmul %308, %1, %cst_120 {dimension_numbers = #tpu.dot_dimension_numbers<[1], [0], [0], [1], [0, 0, 1, 1], [], []>} : vector<8x32xf32>, vector<32x32xf32>, vector<8x32xf32> -> vector<8x32xf32>
    %c7 = arith.constant 7 : index
    %c0_121 = arith.constant 0 : index
    %310 = vector.load %arg1[%c7, %c0_121] : memref<20x32xf32, #tpu.memory_space<vmem>>, vector<1x32xf32>
    %311 = vector.broadcast %310 : vector<1x32xf32> to vector<8x32xf32>
    %312 = arith.addf %309, %311 : vector<8x32xf32>
    %cst_122 = arith.constant 0.949999988 : f32
    %313 = vector.broadcast %cst_122 : f32 to vector<8x32xf32>
    %314 = arith.mulf %313, %277 : vector<8x32xf32>
    %315 = arith.addf %314, %312 : vector<8x32xf32>
    %cst_123 = arith.constant -1.000000e+00 : f32
    %316 = vector.broadcast %cst_123 : f32 to vector<8x32xf32>
    %317 = arith.mulf %316, %283 : vector<8x32xf32>
    %318 = arith.addf %315, %317 : vector<8x32xf32>
    %cst_124 = arith.constant 1.000000e+00 : f32
    %319 = vector.broadcast %cst_124 : f32 to vector<8x32xf32>
    %320 = arith.subf %277, %319 : vector<8x32xf32>
    %cst_125 = arith.constant 0.000000e+00 : f32
    %321 = vector.broadcast %cst_125 : f32 to vector<8x32xf32>
    %322 = arith.cmpf ogt, %320, %321 : vector<8x32xf32>
    %323 = arith.extui %322 : vector<8x32xi1> to vector<8x32xi32>
    %324 = arith.sitofp %323 : vector<8x32xi32> to vector<8x32xf32>
    %cst_126 = arith.constant dense<0.000000e+00> : vector<8x32xf32>
    %325 = tpu.matmul %324, %2, %cst_126 {dimension_numbers = #tpu.dot_dimension_numbers<[1], [0], [0], [1], [0, 0, 1, 1], [], []>} : vector<8x32xf32>, vector<32x32xf32>, vector<8x32xf32> -> vector<8x32xf32>
    %cst_127 = arith.constant 0.949999988 : f32
    %326 = vector.broadcast %cst_127 : f32 to vector<8x32xf32>
    %327 = arith.mulf %326, %290 : vector<8x32xf32>
    %328 = arith.addf %327, %325 : vector<8x32xf32>
    %cst_128 = arith.constant -1.000000e+00 : f32
    %329 = vector.broadcast %cst_128 : f32 to vector<8x32xf32>
    %330 = arith.mulf %329, %296 : vector<8x32xf32>
    %331 = arith.addf %328, %330 : vector<8x32xf32>
    %cst_129 = arith.constant 1.000000e+00 : f32
    %332 = vector.broadcast %cst_129 : f32 to vector<8x32xf32>
    %333 = arith.subf %290, %332 : vector<8x32xf32>
    %cst_130 = arith.constant 0.000000e+00 : f32
    %334 = vector.broadcast %cst_130 : f32 to vector<8x32xf32>
    %335 = arith.cmpf ogt, %333, %334 : vector<8x32xf32>
    %336 = arith.extui %335 : vector<8x32xi1> to vector<8x32xi32>
    %337 = arith.sitofp %336 : vector<8x32xi32> to vector<8x32xf32>
    %cst_131 = arith.constant 0.949999988 : f32
    %338 = vector.broadcast %cst_131 : f32 to vector<8x32xf32>
    %339 = arith.mulf %338, %302 : vector<8x32xf32>
    %340 = arith.addf %339, %337 : vector<8x32xf32>
    %cst_132 = arith.constant -1.000000e+00 : f32
    %341 = vector.broadcast %cst_132 : f32 to vector<8x32xf32>
    %342 = arith.mulf %341, %308 : vector<8x32xf32>
    %343 = arith.addf %340, %342 : vector<8x32xf32>
    %cst_133 = arith.constant 1.000000e+00 : f32
    %344 = vector.broadcast %cst_133 : f32 to vector<8x32xf32>
    %345 = arith.subf %302, %344 : vector<8x32xf32>
    %cst_134 = arith.constant 0.000000e+00 : f32
    %346 = vector.broadcast %cst_134 : f32 to vector<8x32xf32>
    %347 = arith.cmpf ogt, %345, %346 : vector<8x32xf32>
    %348 = arith.extui %347 : vector<8x32xi1> to vector<8x32xi32>
    %349 = arith.sitofp %348 : vector<8x32xi32> to vector<8x32xf32>
    %cst_135 = arith.constant dense<0.000000e+00> : vector<8x32xf32>
    %350 = tpu.matmul %349, %1, %cst_135 {dimension_numbers = #tpu.dot_dimension_numbers<[1], [0], [0], [1], [0, 0, 1, 1], [], []>} : vector<8x32xf32>, vector<32x32xf32>, vector<8x32xf32> -> vector<8x32xf32>
    %c8 = arith.constant 8 : index
    %c0_136 = arith.constant 0 : index
    %351 = vector.load %arg1[%c8, %c0_136] : memref<20x32xf32, #tpu.memory_space<vmem>>, vector<1x32xf32>
    %352 = vector.broadcast %351 : vector<1x32xf32> to vector<8x32xf32>
    %353 = arith.addf %350, %352 : vector<8x32xf32>
    %cst_137 = arith.constant 0.949999988 : f32
    %354 = vector.broadcast %cst_137 : f32 to vector<8x32xf32>
    %355 = arith.mulf %354, %318 : vector<8x32xf32>
    %356 = arith.addf %355, %353 : vector<8x32xf32>
    %cst_138 = arith.constant -1.000000e+00 : f32
    %357 = vector.broadcast %cst_138 : f32 to vector<8x32xf32>
    %358 = arith.mulf %357, %324 : vector<8x32xf32>
    %359 = arith.addf %356, %358 : vector<8x32xf32>
    %cst_139 = arith.constant 1.000000e+00 : f32
    %360 = vector.broadcast %cst_139 : f32 to vector<8x32xf32>
    %361 = arith.subf %318, %360 : vector<8x32xf32>
    %cst_140 = arith.constant 0.000000e+00 : f32
    %362 = vector.broadcast %cst_140 : f32 to vector<8x32xf32>
    %363 = arith.cmpf ogt, %361, %362 : vector<8x32xf32>
    %364 = arith.extui %363 : vector<8x32xi1> to vector<8x32xi32>
    %365 = arith.sitofp %364 : vector<8x32xi32> to vector<8x32xf32>
    %cst_141 = arith.constant dense<0.000000e+00> : vector<8x32xf32>
    %366 = tpu.matmul %365, %2, %cst_141 {dimension_numbers = #tpu.dot_dimension_numbers<[1], [0], [0], [1], [0, 0, 1, 1], [], []>} : vector<8x32xf32>, vector<32x32xf32>, vector<8x32xf32> -> vector<8x32xf32>
    %cst_142 = arith.constant 0.949999988 : f32
    %367 = vector.broadcast %cst_142 : f32 to vector<8x32xf32>
    %368 = arith.mulf %367, %331 : vector<8x32xf32>
    %369 = arith.addf %368, %366 : vector<8x32xf32>
    %cst_143 = arith.constant -1.000000e+00 : f32
    %370 = vector.broadcast %cst_143 : f32 to vector<8x32xf32>
    %371 = arith.mulf %370, %337 : vector<8x32xf32>
    %372 = arith.addf %369, %371 : vector<8x32xf32>
    %cst_144 = arith.constant 1.000000e+00 : f32
    %373 = vector.broadcast %cst_144 : f32 to vector<8x32xf32>
    %374 = arith.subf %331, %373 : vector<8x32xf32>
    %cst_145 = arith.constant 0.000000e+00 : f32
    %375 = vector.broadcast %cst_145 : f32 to vector<8x32xf32>
    %376 = arith.cmpf ogt, %374, %375 : vector<8x32xf32>
    %377 = arith.extui %376 : vector<8x32xi1> to vector<8x32xi32>
    %378 = arith.sitofp %377 : vector<8x32xi32> to vector<8x32xf32>
    %cst_146 = arith.constant 0.949999988 : f32
    %379 = vector.broadcast %cst_146 : f32 to vector<8x32xf32>
    %380 = arith.mulf %379, %343 : vector<8x32xf32>
    %381 = arith.addf %380, %378 : vector<8x32xf32>
    %cst_147 = arith.constant -1.000000e+00 : f32
    %382 = vector.broadcast %cst_147 : f32 to vector<8x32xf32>
    %383 = arith.mulf %382, %349 : vector<8x32xf32>
    %384 = arith.addf %381, %383 : vector<8x32xf32>
    %cst_148 = arith.constant 1.000000e+00 : f32
    %385 = vector.broadcast %cst_148 : f32 to vector<8x32xf32>
    %386 = arith.subf %343, %385 : vector<8x32xf32>
    %cst_149 = arith.constant 0.000000e+00 : f32
    %387 = vector.broadcast %cst_149 : f32 to vector<8x32xf32>
    %388 = arith.cmpf ogt, %386, %387 : vector<8x32xf32>
    %389 = arith.extui %388 : vector<8x32xi1> to vector<8x32xi32>
    %390 = arith.sitofp %389 : vector<8x32xi32> to vector<8x32xf32>
    %cst_150 = arith.constant dense<0.000000e+00> : vector<8x32xf32>
    %391 = tpu.matmul %390, %1, %cst_150 {dimension_numbers = #tpu.dot_dimension_numbers<[1], [0], [0], [1], [0, 0, 1, 1], [], []>} : vector<8x32xf32>, vector<32x32xf32>, vector<8x32xf32> -> vector<8x32xf32>
    %c9 = arith.constant 9 : index
    %c0_151 = arith.constant 0 : index
    %392 = vector.load %arg1[%c9, %c0_151] : memref<20x32xf32, #tpu.memory_space<vmem>>, vector<1x32xf32>
    %393 = vector.broadcast %392 : vector<1x32xf32> to vector<8x32xf32>
    %394 = arith.addf %391, %393 : vector<8x32xf32>
    %cst_152 = arith.constant 0.949999988 : f32
    %395 = vector.broadcast %cst_152 : f32 to vector<8x32xf32>
    %396 = arith.mulf %395, %359 : vector<8x32xf32>
    %397 = arith.addf %396, %394 : vector<8x32xf32>
    %cst_153 = arith.constant -1.000000e+00 : f32
    %398 = vector.broadcast %cst_153 : f32 to vector<8x32xf32>
    %399 = arith.mulf %398, %365 : vector<8x32xf32>
    %400 = arith.addf %397, %399 : vector<8x32xf32>
    %cst_154 = arith.constant 1.000000e+00 : f32
    %401 = vector.broadcast %cst_154 : f32 to vector<8x32xf32>
    %402 = arith.subf %359, %401 : vector<8x32xf32>
    %cst_155 = arith.constant 0.000000e+00 : f32
    %403 = vector.broadcast %cst_155 : f32 to vector<8x32xf32>
    %404 = arith.cmpf ogt, %402, %403 : vector<8x32xf32>
    %405 = arith.extui %404 : vector<8x32xi1> to vector<8x32xi32>
    %406 = arith.sitofp %405 : vector<8x32xi32> to vector<8x32xf32>
    %cst_156 = arith.constant dense<0.000000e+00> : vector<8x32xf32>
    %407 = tpu.matmul %406, %2, %cst_156 {dimension_numbers = #tpu.dot_dimension_numbers<[1], [0], [0], [1], [0, 0, 1, 1], [], []>} : vector<8x32xf32>, vector<32x32xf32>, vector<8x32xf32> -> vector<8x32xf32>
    %cst_157 = arith.constant 0.949999988 : f32
    %408 = vector.broadcast %cst_157 : f32 to vector<8x32xf32>
    %409 = arith.mulf %408, %372 : vector<8x32xf32>
    %410 = arith.addf %409, %407 : vector<8x32xf32>
    %cst_158 = arith.constant -1.000000e+00 : f32
    %411 = vector.broadcast %cst_158 : f32 to vector<8x32xf32>
    %412 = arith.mulf %411, %378 : vector<8x32xf32>
    %413 = arith.addf %410, %412 : vector<8x32xf32>
    %cst_159 = arith.constant 1.000000e+00 : f32
    %414 = vector.broadcast %cst_159 : f32 to vector<8x32xf32>
    %415 = arith.subf %372, %414 : vector<8x32xf32>
    %cst_160 = arith.constant 0.000000e+00 : f32
    %416 = vector.broadcast %cst_160 : f32 to vector<8x32xf32>
    %417 = arith.cmpf ogt, %415, %416 : vector<8x32xf32>
    %418 = arith.extui %417 : vector<8x32xi1> to vector<8x32xi32>
    %419 = arith.sitofp %418 : vector<8x32xi32> to vector<8x32xf32>
    %cst_161 = arith.constant 0.949999988 : f32
    %420 = vector.broadcast %cst_161 : f32 to vector<8x32xf32>
    %421 = arith.mulf %420, %384 : vector<8x32xf32>
    %422 = arith.addf %421, %419 : vector<8x32xf32>
    %cst_162 = arith.constant -1.000000e+00 : f32
    %423 = vector.broadcast %cst_162 : f32 to vector<8x32xf32>
    %424 = arith.mulf %423, %390 : vector<8x32xf32>
    %425 = arith.addf %422, %424 : vector<8x32xf32>
    %cst_163 = arith.constant 1.000000e+00 : f32
    %426 = vector.broadcast %cst_163 : f32 to vector<8x32xf32>
    %427 = arith.subf %384, %426 : vector<8x32xf32>
    %cst_164 = arith.constant 0.000000e+00 : f32
    %428 = vector.broadcast %cst_164 : f32 to vector<8x32xf32>
    %429 = arith.cmpf ogt, %427, %428 : vector<8x32xf32>
    %430 = arith.extui %429 : vector<8x32xi1> to vector<8x32xi32>
    %431 = arith.sitofp %430 : vector<8x32xi32> to vector<8x32xf32>
    %cst_165 = arith.constant dense<0.000000e+00> : vector<8x32xf32>
    %432 = tpu.matmul %431, %1, %cst_165 {dimension_numbers = #tpu.dot_dimension_numbers<[1], [0], [0], [1], [0, 0, 1, 1], [], []>} : vector<8x32xf32>, vector<32x32xf32>, vector<8x32xf32> -> vector<8x32xf32>
    %c10 = arith.constant 10 : index
    %c0_166 = arith.constant 0 : index
    %433 = vector.load %arg1[%c10, %c0_166] : memref<20x32xf32, #tpu.memory_space<vmem>>, vector<1x32xf32>
    %434 = vector.broadcast %433 : vector<1x32xf32> to vector<8x32xf32>
    %435 = arith.addf %432, %434 : vector<8x32xf32>
    %cst_167 = arith.constant 0.949999988 : f32
    %436 = vector.broadcast %cst_167 : f32 to vector<8x32xf32>
    %437 = arith.mulf %436, %400 : vector<8x32xf32>
    %438 = arith.addf %437, %435 : vector<8x32xf32>
    %cst_168 = arith.constant -1.000000e+00 : f32
    %439 = vector.broadcast %cst_168 : f32 to vector<8x32xf32>
    %440 = arith.mulf %439, %406 : vector<8x32xf32>
    %441 = arith.addf %438, %440 : vector<8x32xf32>
    %cst_169 = arith.constant 1.000000e+00 : f32
    %442 = vector.broadcast %cst_169 : f32 to vector<8x32xf32>
    %443 = arith.subf %400, %442 : vector<8x32xf32>
    %cst_170 = arith.constant 0.000000e+00 : f32
    %444 = vector.broadcast %cst_170 : f32 to vector<8x32xf32>
    %445 = arith.cmpf ogt, %443, %444 : vector<8x32xf32>
    %446 = arith.extui %445 : vector<8x32xi1> to vector<8x32xi32>
    %447 = arith.sitofp %446 : vector<8x32xi32> to vector<8x32xf32>
    %cst_171 = arith.constant dense<0.000000e+00> : vector<8x32xf32>
    %448 = tpu.matmul %447, %2, %cst_171 {dimension_numbers = #tpu.dot_dimension_numbers<[1], [0], [0], [1], [0, 0, 1, 1], [], []>} : vector<8x32xf32>, vector<32x32xf32>, vector<8x32xf32> -> vector<8x32xf32>
    %cst_172 = arith.constant 0.949999988 : f32
    %449 = vector.broadcast %cst_172 : f32 to vector<8x32xf32>
    %450 = arith.mulf %449, %413 : vector<8x32xf32>
    %451 = arith.addf %450, %448 : vector<8x32xf32>
    %cst_173 = arith.constant -1.000000e+00 : f32
    %452 = vector.broadcast %cst_173 : f32 to vector<8x32xf32>
    %453 = arith.mulf %452, %419 : vector<8x32xf32>
    %454 = arith.addf %451, %453 : vector<8x32xf32>
    %cst_174 = arith.constant 1.000000e+00 : f32
    %455 = vector.broadcast %cst_174 : f32 to vector<8x32xf32>
    %456 = arith.subf %413, %455 : vector<8x32xf32>
    %cst_175 = arith.constant 0.000000e+00 : f32
    %457 = vector.broadcast %cst_175 : f32 to vector<8x32xf32>
    %458 = arith.cmpf ogt, %456, %457 : vector<8x32xf32>
    %459 = arith.extui %458 : vector<8x32xi1> to vector<8x32xi32>
    %460 = arith.sitofp %459 : vector<8x32xi32> to vector<8x32xf32>
    %cst_176 = arith.constant 0.949999988 : f32
    %461 = vector.broadcast %cst_176 : f32 to vector<8x32xf32>
    %462 = arith.mulf %461, %425 : vector<8x32xf32>
    %463 = arith.addf %462, %460 : vector<8x32xf32>
    %cst_177 = arith.constant -1.000000e+00 : f32
    %464 = vector.broadcast %cst_177 : f32 to vector<8x32xf32>
    %465 = arith.mulf %464, %431 : vector<8x32xf32>
    %466 = arith.addf %463, %465 : vector<8x32xf32>
    %cst_178 = arith.constant 1.000000e+00 : f32
    %467 = vector.broadcast %cst_178 : f32 to vector<8x32xf32>
    %468 = arith.subf %425, %467 : vector<8x32xf32>
    %cst_179 = arith.constant 0.000000e+00 : f32
    %469 = vector.broadcast %cst_179 : f32 to vector<8x32xf32>
    %470 = arith.cmpf ogt, %468, %469 : vector<8x32xf32>
    %471 = arith.extui %470 : vector<8x32xi1> to vector<8x32xi32>
    %472 = arith.sitofp %471 : vector<8x32xi32> to vector<8x32xf32>
    %cst_180 = arith.constant dense<0.000000e+00> : vector<8x32xf32>
    %473 = tpu.matmul %472, %1, %cst_180 {dimension_numbers = #tpu.dot_dimension_numbers<[1], [0], [0], [1], [0, 0, 1, 1], [], []>} : vector<8x32xf32>, vector<32x32xf32>, vector<8x32xf32> -> vector<8x32xf32>
    %c11 = arith.constant 11 : index
    %c0_181 = arith.constant 0 : index
    %474 = vector.load %arg1[%c11, %c0_181] : memref<20x32xf32, #tpu.memory_space<vmem>>, vector<1x32xf32>
    %475 = vector.broadcast %474 : vector<1x32xf32> to vector<8x32xf32>
    %476 = arith.addf %473, %475 : vector<8x32xf32>
    %cst_182 = arith.constant 0.949999988 : f32
    %477 = vector.broadcast %cst_182 : f32 to vector<8x32xf32>
    %478 = arith.mulf %477, %441 : vector<8x32xf32>
    %479 = arith.addf %478, %476 : vector<8x32xf32>
    %cst_183 = arith.constant -1.000000e+00 : f32
    %480 = vector.broadcast %cst_183 : f32 to vector<8x32xf32>
    %481 = arith.mulf %480, %447 : vector<8x32xf32>
    %482 = arith.addf %479, %481 : vector<8x32xf32>
    %cst_184 = arith.constant 1.000000e+00 : f32
    %483 = vector.broadcast %cst_184 : f32 to vector<8x32xf32>
    %484 = arith.subf %441, %483 : vector<8x32xf32>
    %cst_185 = arith.constant 0.000000e+00 : f32
    %485 = vector.broadcast %cst_185 : f32 to vector<8x32xf32>
    %486 = arith.cmpf ogt, %484, %485 : vector<8x32xf32>
    %487 = arith.extui %486 : vector<8x32xi1> to vector<8x32xi32>
    %488 = arith.sitofp %487 : vector<8x32xi32> to vector<8x32xf32>
    %cst_186 = arith.constant dense<0.000000e+00> : vector<8x32xf32>
    %489 = tpu.matmul %488, %2, %cst_186 {dimension_numbers = #tpu.dot_dimension_numbers<[1], [0], [0], [1], [0, 0, 1, 1], [], []>} : vector<8x32xf32>, vector<32x32xf32>, vector<8x32xf32> -> vector<8x32xf32>
    %cst_187 = arith.constant 0.949999988 : f32
    %490 = vector.broadcast %cst_187 : f32 to vector<8x32xf32>
    %491 = arith.mulf %490, %454 : vector<8x32xf32>
    %492 = arith.addf %491, %489 : vector<8x32xf32>
    %cst_188 = arith.constant -1.000000e+00 : f32
    %493 = vector.broadcast %cst_188 : f32 to vector<8x32xf32>
    %494 = arith.mulf %493, %460 : vector<8x32xf32>
    %495 = arith.addf %492, %494 : vector<8x32xf32>
    %cst_189 = arith.constant 1.000000e+00 : f32
    %496 = vector.broadcast %cst_189 : f32 to vector<8x32xf32>
    %497 = arith.subf %454, %496 : vector<8x32xf32>
    %cst_190 = arith.constant 0.000000e+00 : f32
    %498 = vector.broadcast %cst_190 : f32 to vector<8x32xf32>
    %499 = arith.cmpf ogt, %497, %498 : vector<8x32xf32>
    %500 = arith.extui %499 : vector<8x32xi1> to vector<8x32xi32>
    %501 = arith.sitofp %500 : vector<8x32xi32> to vector<8x32xf32>
    %cst_191 = arith.constant 0.949999988 : f32
    %502 = vector.broadcast %cst_191 : f32 to vector<8x32xf32>
    %503 = arith.mulf %502, %466 : vector<8x32xf32>
    %504 = arith.addf %503, %501 : vector<8x32xf32>
    %cst_192 = arith.constant -1.000000e+00 : f32
    %505 = vector.broadcast %cst_192 : f32 to vector<8x32xf32>
    %506 = arith.mulf %505, %472 : vector<8x32xf32>
    %507 = arith.addf %504, %506 : vector<8x32xf32>
    %cst_193 = arith.constant 1.000000e+00 : f32
    %508 = vector.broadcast %cst_193 : f32 to vector<8x32xf32>
    %509 = arith.subf %466, %508 : vector<8x32xf32>
    %cst_194 = arith.constant 0.000000e+00 : f32
    %510 = vector.broadcast %cst_194 : f32 to vector<8x32xf32>
    %511 = arith.cmpf ogt, %509, %510 : vector<8x32xf32>
    %512 = arith.extui %511 : vector<8x32xi1> to vector<8x32xi32>
    %513 = arith.sitofp %512 : vector<8x32xi32> to vector<8x32xf32>
    %cst_195 = arith.constant dense<0.000000e+00> : vector<8x32xf32>
    %514 = tpu.matmul %513, %1, %cst_195 {dimension_numbers = #tpu.dot_dimension_numbers<[1], [0], [0], [1], [0, 0, 1, 1], [], []>} : vector<8x32xf32>, vector<32x32xf32>, vector<8x32xf32> -> vector<8x32xf32>
    %c12 = arith.constant 12 : index
    %c0_196 = arith.constant 0 : index
    %515 = vector.load %arg1[%c12, %c0_196] : memref<20x32xf32, #tpu.memory_space<vmem>>, vector<1x32xf32>
    %516 = vector.broadcast %515 : vector<1x32xf32> to vector<8x32xf32>
    %517 = arith.addf %514, %516 : vector<8x32xf32>
    %cst_197 = arith.constant 0.949999988 : f32
    %518 = vector.broadcast %cst_197 : f32 to vector<8x32xf32>
    %519 = arith.mulf %518, %482 : vector<8x32xf32>
    %520 = arith.addf %519, %517 : vector<8x32xf32>
    %cst_198 = arith.constant -1.000000e+00 : f32
    %521 = vector.broadcast %cst_198 : f32 to vector<8x32xf32>
    %522 = arith.mulf %521, %488 : vector<8x32xf32>
    %523 = arith.addf %520, %522 : vector<8x32xf32>
    %cst_199 = arith.constant 1.000000e+00 : f32
    %524 = vector.broadcast %cst_199 : f32 to vector<8x32xf32>
    %525 = arith.subf %482, %524 : vector<8x32xf32>
    %cst_200 = arith.constant 0.000000e+00 : f32
    %526 = vector.broadcast %cst_200 : f32 to vector<8x32xf32>
    %527 = arith.cmpf ogt, %525, %526 : vector<8x32xf32>
    %528 = arith.extui %527 : vector<8x32xi1> to vector<8x32xi32>
    %529 = arith.sitofp %528 : vector<8x32xi32> to vector<8x32xf32>
    %cst_201 = arith.constant dense<0.000000e+00> : vector<8x32xf32>
    %530 = tpu.matmul %529, %2, %cst_201 {dimension_numbers = #tpu.dot_dimension_numbers<[1], [0], [0], [1], [0, 0, 1, 1], [], []>} : vector<8x32xf32>, vector<32x32xf32>, vector<8x32xf32> -> vector<8x32xf32>
    %cst_202 = arith.constant 0.949999988 : f32
    %531 = vector.broadcast %cst_202 : f32 to vector<8x32xf32>
    %532 = arith.mulf %531, %495 : vector<8x32xf32>
    %533 = arith.addf %532, %530 : vector<8x32xf32>
    %cst_203 = arith.constant -1.000000e+00 : f32
    %534 = vector.broadcast %cst_203 : f32 to vector<8x32xf32>
    %535 = arith.mulf %534, %501 : vector<8x32xf32>
    %536 = arith.addf %533, %535 : vector<8x32xf32>
    %cst_204 = arith.constant 1.000000e+00 : f32
    %537 = vector.broadcast %cst_204 : f32 to vector<8x32xf32>
    %538 = arith.subf %495, %537 : vector<8x32xf32>
    %cst_205 = arith.constant 0.000000e+00 : f32
    %539 = vector.broadcast %cst_205 : f32 to vector<8x32xf32>
    %540 = arith.cmpf ogt, %538, %539 : vector<8x32xf32>
    %541 = arith.extui %540 : vector<8x32xi1> to vector<8x32xi32>
    %542 = arith.sitofp %541 : vector<8x32xi32> to vector<8x32xf32>
    %cst_206 = arith.constant 0.949999988 : f32
    %543 = vector.broadcast %cst_206 : f32 to vector<8x32xf32>
    %544 = arith.mulf %543, %507 : vector<8x32xf32>
    %545 = arith.addf %544, %542 : vector<8x32xf32>
    %cst_207 = arith.constant -1.000000e+00 : f32
    %546 = vector.broadcast %cst_207 : f32 to vector<8x32xf32>
    %547 = arith.mulf %546, %513 : vector<8x32xf32>
    %548 = arith.addf %545, %547 : vector<8x32xf32>
    %cst_208 = arith.constant 1.000000e+00 : f32
    %549 = vector.broadcast %cst_208 : f32 to vector<8x32xf32>
    %550 = arith.subf %507, %549 : vector<8x32xf32>
    %cst_209 = arith.constant 0.000000e+00 : f32
    %551 = vector.broadcast %cst_209 : f32 to vector<8x32xf32>
    %552 = arith.cmpf ogt, %550, %551 : vector<8x32xf32>
    %553 = arith.extui %552 : vector<8x32xi1> to vector<8x32xi32>
    %554 = arith.sitofp %553 : vector<8x32xi32> to vector<8x32xf32>
    %cst_210 = arith.constant dense<0.000000e+00> : vector<8x32xf32>
    %555 = tpu.matmul %554, %1, %cst_210 {dimension_numbers = #tpu.dot_dimension_numbers<[1], [0], [0], [1], [0, 0, 1, 1], [], []>} : vector<8x32xf32>, vector<32x32xf32>, vector<8x32xf32> -> vector<8x32xf32>
    %c13 = arith.constant 13 : index
    %c0_211 = arith.constant 0 : index
    %556 = vector.load %arg1[%c13, %c0_211] : memref<20x32xf32, #tpu.memory_space<vmem>>, vector<1x32xf32>
    %557 = vector.broadcast %556 : vector<1x32xf32> to vector<8x32xf32>
    %558 = arith.addf %555, %557 : vector<8x32xf32>
    %cst_212 = arith.constant 0.949999988 : f32
    %559 = vector.broadcast %cst_212 : f32 to vector<8x32xf32>
    %560 = arith.mulf %559, %523 : vector<8x32xf32>
    %561 = arith.addf %560, %558 : vector<8x32xf32>
    %cst_213 = arith.constant -1.000000e+00 : f32
    %562 = vector.broadcast %cst_213 : f32 to vector<8x32xf32>
    %563 = arith.mulf %562, %529 : vector<8x32xf32>
    %564 = arith.addf %561, %563 : vector<8x32xf32>
    %cst_214 = arith.constant 1.000000e+00 : f32
    %565 = vector.broadcast %cst_214 : f32 to vector<8x32xf32>
    %566 = arith.subf %523, %565 : vector<8x32xf32>
    %cst_215 = arith.constant 0.000000e+00 : f32
    %567 = vector.broadcast %cst_215 : f32 to vector<8x32xf32>
    %568 = arith.cmpf ogt, %566, %567 : vector<8x32xf32>
    %569 = arith.extui %568 : vector<8x32xi1> to vector<8x32xi32>
    %570 = arith.sitofp %569 : vector<8x32xi32> to vector<8x32xf32>
    %cst_216 = arith.constant dense<0.000000e+00> : vector<8x32xf32>
    %571 = tpu.matmul %570, %2, %cst_216 {dimension_numbers = #tpu.dot_dimension_numbers<[1], [0], [0], [1], [0, 0, 1, 1], [], []>} : vector<8x32xf32>, vector<32x32xf32>, vector<8x32xf32> -> vector<8x32xf32>
    %cst_217 = arith.constant 0.949999988 : f32
    %572 = vector.broadcast %cst_217 : f32 to vector<8x32xf32>
    %573 = arith.mulf %572, %536 : vector<8x32xf32>
    %574 = arith.addf %573, %571 : vector<8x32xf32>
    %cst_218 = arith.constant -1.000000e+00 : f32
    %575 = vector.broadcast %cst_218 : f32 to vector<8x32xf32>
    %576 = arith.mulf %575, %542 : vector<8x32xf32>
    %577 = arith.addf %574, %576 : vector<8x32xf32>
    %cst_219 = arith.constant 1.000000e+00 : f32
    %578 = vector.broadcast %cst_219 : f32 to vector<8x32xf32>
    %579 = arith.subf %536, %578 : vector<8x32xf32>
    %cst_220 = arith.constant 0.000000e+00 : f32
    %580 = vector.broadcast %cst_220 : f32 to vector<8x32xf32>
    %581 = arith.cmpf ogt, %579, %580 : vector<8x32xf32>
    %582 = arith.extui %581 : vector<8x32xi1> to vector<8x32xi32>
    %583 = arith.sitofp %582 : vector<8x32xi32> to vector<8x32xf32>
    %cst_221 = arith.constant 0.949999988 : f32
    %584 = vector.broadcast %cst_221 : f32 to vector<8x32xf32>
    %585 = arith.mulf %584, %548 : vector<8x32xf32>
    %586 = arith.addf %585, %583 : vector<8x32xf32>
    %cst_222 = arith.constant -1.000000e+00 : f32
    %587 = vector.broadcast %cst_222 : f32 to vector<8x32xf32>
    %588 = arith.mulf %587, %554 : vector<8x32xf32>
    %589 = arith.addf %586, %588 : vector<8x32xf32>
    %cst_223 = arith.constant 1.000000e+00 : f32
    %590 = vector.broadcast %cst_223 : f32 to vector<8x32xf32>
    %591 = arith.subf %548, %590 : vector<8x32xf32>
    %cst_224 = arith.constant 0.000000e+00 : f32
    %592 = vector.broadcast %cst_224 : f32 to vector<8x32xf32>
    %593 = arith.cmpf ogt, %591, %592 : vector<8x32xf32>
    %594 = arith.extui %593 : vector<8x32xi1> to vector<8x32xi32>
    %595 = arith.sitofp %594 : vector<8x32xi32> to vector<8x32xf32>
    %cst_225 = arith.constant dense<0.000000e+00> : vector<8x32xf32>
    %596 = tpu.matmul %595, %1, %cst_225 {dimension_numbers = #tpu.dot_dimension_numbers<[1], [0], [0], [1], [0, 0, 1, 1], [], []>} : vector<8x32xf32>, vector<32x32xf32>, vector<8x32xf32> -> vector<8x32xf32>
    %c14 = arith.constant 14 : index
    %c0_226 = arith.constant 0 : index
    %597 = vector.load %arg1[%c14, %c0_226] : memref<20x32xf32, #tpu.memory_space<vmem>>, vector<1x32xf32>
    %598 = vector.broadcast %597 : vector<1x32xf32> to vector<8x32xf32>
    %599 = arith.addf %596, %598 : vector<8x32xf32>
    %cst_227 = arith.constant 0.949999988 : f32
    %600 = vector.broadcast %cst_227 : f32 to vector<8x32xf32>
    %601 = arith.mulf %600, %564 : vector<8x32xf32>
    %602 = arith.addf %601, %599 : vector<8x32xf32>
    %cst_228 = arith.constant -1.000000e+00 : f32
    %603 = vector.broadcast %cst_228 : f32 to vector<8x32xf32>
    %604 = arith.mulf %603, %570 : vector<8x32xf32>
    %605 = arith.addf %602, %604 : vector<8x32xf32>
    %cst_229 = arith.constant 1.000000e+00 : f32
    %606 = vector.broadcast %cst_229 : f32 to vector<8x32xf32>
    %607 = arith.subf %564, %606 : vector<8x32xf32>
    %cst_230 = arith.constant 0.000000e+00 : f32
    %608 = vector.broadcast %cst_230 : f32 to vector<8x32xf32>
    %609 = arith.cmpf ogt, %607, %608 : vector<8x32xf32>
    %610 = arith.extui %609 : vector<8x32xi1> to vector<8x32xi32>
    %611 = arith.sitofp %610 : vector<8x32xi32> to vector<8x32xf32>
    %cst_231 = arith.constant dense<0.000000e+00> : vector<8x32xf32>
    %612 = tpu.matmul %611, %2, %cst_231 {dimension_numbers = #tpu.dot_dimension_numbers<[1], [0], [0], [1], [0, 0, 1, 1], [], []>} : vector<8x32xf32>, vector<32x32xf32>, vector<8x32xf32> -> vector<8x32xf32>
    %cst_232 = arith.constant 0.949999988 : f32
    %613 = vector.broadcast %cst_232 : f32 to vector<8x32xf32>
    %614 = arith.mulf %613, %577 : vector<8x32xf32>
    %615 = arith.addf %614, %612 : vector<8x32xf32>
    %cst_233 = arith.constant -1.000000e+00 : f32
    %616 = vector.broadcast %cst_233 : f32 to vector<8x32xf32>
    %617 = arith.mulf %616, %583 : vector<8x32xf32>
    %618 = arith.addf %615, %617 : vector<8x32xf32>
    %cst_234 = arith.constant 1.000000e+00 : f32
    %619 = vector.broadcast %cst_234 : f32 to vector<8x32xf32>
    %620 = arith.subf %577, %619 : vector<8x32xf32>
    %cst_235 = arith.constant 0.000000e+00 : f32
    %621 = vector.broadcast %cst_235 : f32 to vector<8x32xf32>
    %622 = arith.cmpf ogt, %620, %621 : vector<8x32xf32>
    %623 = arith.extui %622 : vector<8x32xi1> to vector<8x32xi32>
    %624 = arith.sitofp %623 : vector<8x32xi32> to vector<8x32xf32>
    %cst_236 = arith.constant 0.949999988 : f32
    %625 = vector.broadcast %cst_236 : f32 to vector<8x32xf32>
    %626 = arith.mulf %625, %589 : vector<8x32xf32>
    %627 = arith.addf %626, %624 : vector<8x32xf32>
    %cst_237 = arith.constant -1.000000e+00 : f32
    %628 = vector.broadcast %cst_237 : f32 to vector<8x32xf32>
    %629 = arith.mulf %628, %595 : vector<8x32xf32>
    %630 = arith.addf %627, %629 : vector<8x32xf32>
    %cst_238 = arith.constant 1.000000e+00 : f32
    %631 = vector.broadcast %cst_238 : f32 to vector<8x32xf32>
    %632 = arith.subf %589, %631 : vector<8x32xf32>
    %cst_239 = arith.constant 0.000000e+00 : f32
    %633 = vector.broadcast %cst_239 : f32 to vector<8x32xf32>
    %634 = arith.cmpf ogt, %632, %633 : vector<8x32xf32>
    %635 = arith.extui %634 : vector<8x32xi1> to vector<8x32xi32>
    %636 = arith.sitofp %635 : vector<8x32xi32> to vector<8x32xf32>
    %cst_240 = arith.constant dense<0.000000e+00> : vector<8x32xf32>
    %637 = tpu.matmul %636, %1, %cst_240 {dimension_numbers = #tpu.dot_dimension_numbers<[1], [0], [0], [1], [0, 0, 1, 1], [], []>} : vector<8x32xf32>, vector<32x32xf32>, vector<8x32xf32> -> vector<8x32xf32>
    %c15 = arith.constant 15 : index
    %c0_241 = arith.constant 0 : index
    %638 = vector.load %arg1[%c15, %c0_241] : memref<20x32xf32, #tpu.memory_space<vmem>>, vector<1x32xf32>
    %639 = vector.broadcast %638 : vector<1x32xf32> to vector<8x32xf32>
    %640 = arith.addf %637, %639 : vector<8x32xf32>
    %cst_242 = arith.constant 0.949999988 : f32
    %641 = vector.broadcast %cst_242 : f32 to vector<8x32xf32>
    %642 = arith.mulf %641, %605 : vector<8x32xf32>
    %643 = arith.addf %642, %640 : vector<8x32xf32>
    %cst_243 = arith.constant -1.000000e+00 : f32
    %644 = vector.broadcast %cst_243 : f32 to vector<8x32xf32>
    %645 = arith.mulf %644, %611 : vector<8x32xf32>
    %646 = arith.addf %643, %645 : vector<8x32xf32>
    %cst_244 = arith.constant 1.000000e+00 : f32
    %647 = vector.broadcast %cst_244 : f32 to vector<8x32xf32>
    %648 = arith.subf %605, %647 : vector<8x32xf32>
    %cst_245 = arith.constant 0.000000e+00 : f32
    %649 = vector.broadcast %cst_245 : f32 to vector<8x32xf32>
    %650 = arith.cmpf ogt, %648, %649 : vector<8x32xf32>
    %651 = arith.extui %650 : vector<8x32xi1> to vector<8x32xi32>
    %652 = arith.sitofp %651 : vector<8x32xi32> to vector<8x32xf32>
    %cst_246 = arith.constant dense<0.000000e+00> : vector<8x32xf32>
    %653 = tpu.matmul %652, %2, %cst_246 {dimension_numbers = #tpu.dot_dimension_numbers<[1], [0], [0], [1], [0, 0, 1, 1], [], []>} : vector<8x32xf32>, vector<32x32xf32>, vector<8x32xf32> -> vector<8x32xf32>
    %cst_247 = arith.constant 0.949999988 : f32
    %654 = vector.broadcast %cst_247 : f32 to vector<8x32xf32>
    %655 = arith.mulf %654, %618 : vector<8x32xf32>
    %656 = arith.addf %655, %653 : vector<8x32xf32>
    %cst_248 = arith.constant -1.000000e+00 : f32
    %657 = vector.broadcast %cst_248 : f32 to vector<8x32xf32>
    %658 = arith.mulf %657, %624 : vector<8x32xf32>
    %659 = arith.addf %656, %658 : vector<8x32xf32>
    %cst_249 = arith.constant 1.000000e+00 : f32
    %660 = vector.broadcast %cst_249 : f32 to vector<8x32xf32>
    %661 = arith.subf %618, %660 : vector<8x32xf32>
    %cst_250 = arith.constant 0.000000e+00 : f32
    %662 = vector.broadcast %cst_250 : f32 to vector<8x32xf32>
    %663 = arith.cmpf ogt, %661, %662 : vector<8x32xf32>
    %664 = arith.extui %663 : vector<8x32xi1> to vector<8x32xi32>
    %665 = arith.sitofp %664 : vector<8x32xi32> to vector<8x32xf32>
    %cst_251 = arith.constant 0.949999988 : f32
    %666 = vector.broadcast %cst_251 : f32 to vector<8x32xf32>
    %667 = arith.mulf %666, %630 : vector<8x32xf32>
    %668 = arith.addf %667, %665 : vector<8x32xf32>
    %cst_252 = arith.constant -1.000000e+00 : f32
    %669 = vector.broadcast %cst_252 : f32 to vector<8x32xf32>
    %670 = arith.mulf %669, %636 : vector<8x32xf32>
    %671 = arith.addf %668, %670 : vector<8x32xf32>
    %cst_253 = arith.constant 1.000000e+00 : f32
    %672 = vector.broadcast %cst_253 : f32 to vector<8x32xf32>
    %673 = arith.subf %630, %672 : vector<8x32xf32>
    %cst_254 = arith.constant 0.000000e+00 : f32
    %674 = vector.broadcast %cst_254 : f32 to vector<8x32xf32>
    %675 = arith.cmpf ogt, %673, %674 : vector<8x32xf32>
    %676 = arith.extui %675 : vector<8x32xi1> to vector<8x32xi32>
    %677 = arith.sitofp %676 : vector<8x32xi32> to vector<8x32xf32>
    %cst_255 = arith.constant dense<0.000000e+00> : vector<8x32xf32>
    %678 = tpu.matmul %677, %1, %cst_255 {dimension_numbers = #tpu.dot_dimension_numbers<[1], [0], [0], [1], [0, 0, 1, 1], [], []>} : vector<8x32xf32>, vector<32x32xf32>, vector<8x32xf32> -> vector<8x32xf32>
    %c16 = arith.constant 16 : index
    %c0_256 = arith.constant 0 : index
    %679 = vector.load %arg1[%c16, %c0_256] : memref<20x32xf32, #tpu.memory_space<vmem>>, vector<1x32xf32>
    %680 = vector.broadcast %679 : vector<1x32xf32> to vector<8x32xf32>
    %681 = arith.addf %678, %680 : vector<8x32xf32>
    %cst_257 = arith.constant 0.949999988 : f32
    %682 = vector.broadcast %cst_257 : f32 to vector<8x32xf32>
    %683 = arith.mulf %682, %646 : vector<8x32xf32>
    %684 = arith.addf %683, %681 : vector<8x32xf32>
    %cst_258 = arith.constant -1.000000e+00 : f32
    %685 = vector.broadcast %cst_258 : f32 to vector<8x32xf32>
    %686 = arith.mulf %685, %652 : vector<8x32xf32>
    %687 = arith.addf %684, %686 : vector<8x32xf32>
    %cst_259 = arith.constant 1.000000e+00 : f32
    %688 = vector.broadcast %cst_259 : f32 to vector<8x32xf32>
    %689 = arith.subf %646, %688 : vector<8x32xf32>
    %cst_260 = arith.constant 0.000000e+00 : f32
    %690 = vector.broadcast %cst_260 : f32 to vector<8x32xf32>
    %691 = arith.cmpf ogt, %689, %690 : vector<8x32xf32>
    %692 = arith.extui %691 : vector<8x32xi1> to vector<8x32xi32>
    %693 = arith.sitofp %692 : vector<8x32xi32> to vector<8x32xf32>
    %cst_261 = arith.constant 1.000000e+00 : f32
    %694 = vector.broadcast %cst_261 : f32 to vector<8x32xf32>
    %695 = arith.subf %659, %694 : vector<8x32xf32>
    %cst_262 = arith.constant 0.000000e+00 : f32
    %696 = vector.broadcast %cst_262 : f32 to vector<8x32xf32>
    %697 = arith.cmpf ogt, %695, %696 : vector<8x32xf32>
    %698 = arith.extui %697 : vector<8x32xi1> to vector<8x32xi32>
    %699 = arith.sitofp %698 : vector<8x32xi32> to vector<8x32xf32>
    %cst_263 = arith.constant 0.949999988 : f32
    %700 = vector.broadcast %cst_263 : f32 to vector<8x32xf32>
    %701 = arith.mulf %700, %671 : vector<8x32xf32>
    %702 = arith.addf %701, %699 : vector<8x32xf32>
    %cst_264 = arith.constant -1.000000e+00 : f32
    %703 = vector.broadcast %cst_264 : f32 to vector<8x32xf32>
    %704 = arith.mulf %703, %677 : vector<8x32xf32>
    %705 = arith.addf %702, %704 : vector<8x32xf32>
    %cst_265 = arith.constant 1.000000e+00 : f32
    %706 = vector.broadcast %cst_265 : f32 to vector<8x32xf32>
    %707 = arith.subf %671, %706 : vector<8x32xf32>
    %cst_266 = arith.constant 0.000000e+00 : f32
    %708 = vector.broadcast %cst_266 : f32 to vector<8x32xf32>
    %709 = arith.cmpf ogt, %707, %708 : vector<8x32xf32>
    %710 = arith.extui %709 : vector<8x32xi1> to vector<8x32xi32>
    %711 = arith.sitofp %710 : vector<8x32xi32> to vector<8x32xf32>
    %cst_267 = arith.constant dense<0.000000e+00> : vector<8x32xf32>
    %712 = tpu.matmul %711, %1, %cst_267 {dimension_numbers = #tpu.dot_dimension_numbers<[1], [0], [0], [1], [0, 0, 1, 1], [], []>} : vector<8x32xf32>, vector<32x32xf32>, vector<8x32xf32> -> vector<8x32xf32>
    %c17 = arith.constant 17 : index
    %c0_268 = arith.constant 0 : index
    %713 = vector.load %arg1[%c17, %c0_268] : memref<20x32xf32, #tpu.memory_space<vmem>>, vector<1x32xf32>
    %714 = vector.broadcast %713 : vector<1x32xf32> to vector<8x32xf32>
    %715 = arith.addf %712, %714 : vector<8x32xf32>
    %cst_269 = arith.constant 0.949999988 : f32
    %716 = vector.broadcast %cst_269 : f32 to vector<8x32xf32>
    %717 = arith.mulf %716, %687 : vector<8x32xf32>
    %718 = arith.addf %717, %715 : vector<8x32xf32>
    %cst_270 = arith.constant -1.000000e+00 : f32
    %719 = vector.broadcast %cst_270 : f32 to vector<8x32xf32>
    %720 = arith.mulf %719, %693 : vector<8x32xf32>
    %721 = arith.addf %718, %720 : vector<8x32xf32>
    %cst_271 = arith.constant 1.000000e+00 : f32
    %722 = vector.broadcast %cst_271 : f32 to vector<8x32xf32>
    %723 = arith.subf %687, %722 : vector<8x32xf32>
    %cst_272 = arith.constant 0.000000e+00 : f32
    %724 = vector.broadcast %cst_272 : f32 to vector<8x32xf32>
    %725 = arith.cmpf ogt, %723, %724 : vector<8x32xf32>
    %726 = arith.extui %725 : vector<8x32xi1> to vector<8x32xi32>
    %727 = arith.sitofp %726 : vector<8x32xi32> to vector<8x32xf32>
    %cst_273 = arith.constant 1.000000e+00 : f32
    %728 = vector.broadcast %cst_273 : f32 to vector<8x32xf32>
    %729 = arith.subf %705, %728 : vector<8x32xf32>
    %cst_274 = arith.constant 0.000000e+00 : f32
    %730 = vector.broadcast %cst_274 : f32 to vector<8x32xf32>
    %731 = arith.cmpf ogt, %729, %730 : vector<8x32xf32>
    %732 = arith.extui %731 : vector<8x32xi1> to vector<8x32xi32>
    %733 = arith.sitofp %732 : vector<8x32xi32> to vector<8x32xf32>
    %cst_275 = arith.constant dense<0.000000e+00> : vector<8x32xf32>
    %734 = tpu.matmul %733, %1, %cst_275 {dimension_numbers = #tpu.dot_dimension_numbers<[1], [0], [0], [1], [0, 0, 1, 1], [], []>} : vector<8x32xf32>, vector<32x32xf32>, vector<8x32xf32> -> vector<8x32xf32>
    %c18 = arith.constant 18 : index
    %c0_276 = arith.constant 0 : index
    %735 = vector.load %arg1[%c18, %c0_276] : memref<20x32xf32, #tpu.memory_space<vmem>>, vector<1x32xf32>
    %736 = vector.broadcast %735 : vector<1x32xf32> to vector<8x32xf32>
    %737 = arith.addf %734, %736 : vector<8x32xf32>
    %cst_277 = arith.constant 0.949999988 : f32
    %738 = vector.broadcast %cst_277 : f32 to vector<8x32xf32>
    %739 = arith.mulf %738, %721 : vector<8x32xf32>
    %740 = arith.addf %739, %737 : vector<8x32xf32>
    %cst_278 = arith.constant -1.000000e+00 : f32
    %741 = vector.broadcast %cst_278 : f32 to vector<8x32xf32>
    %742 = arith.mulf %741, %727 : vector<8x32xf32>
    %743 = arith.addf %740, %742 : vector<8x32xf32>
    %cst_279 = arith.constant 1.000000e+00 : f32
    %744 = vector.broadcast %cst_279 : f32 to vector<8x32xf32>
    %745 = arith.subf %743, %744 : vector<8x32xf32>
    %cst_280 = arith.constant 0.000000e+00 : f32
    %746 = vector.broadcast %cst_280 : f32 to vector<8x32xf32>
    %747 = arith.cmpf ogt, %745, %746 : vector<8x32xf32>
    %748 = arith.extui %747 : vector<8x32xi1> to vector<8x32xi32>
    %749 = arith.sitofp %748 : vector<8x32xi32> to vector<8x32xf32>
    %c0_281 = arith.constant 0 : index
    %c0_282 = arith.constant 0 : index
    %750 = vector.load %arg4[%c0_281, %c0_282] : memref<32x2xf32, #tpu.memory_space<vmem>>, vector<32x2xf32>
    %cst_283 = arith.constant dense<0.000000e+00> : vector<8x2xf32>
    %751 = tpu.matmul %749, %750, %cst_283 {dimension_numbers = #tpu.dot_dimension_numbers<[1], [0], [0], [1], [0, 0, 1, 1], [], []>} : vector<8x32xf32>, vector<32x2xf32>, vector<8x2xf32> -> vector<8x2xf32>
    %c0_284 = arith.constant 0 : index
    %c0_285 = arith.constant 0 : index
    %752 = vector.load %arg5[%c0_284, %c0_285] : memref<8x2xf32, #tpu.memory_space<vmem>>, vector<8x2xf32>
    tpu.vector_store %arg5[%c0_284, %c0_285], %751 {strides = array<i32>} : memref<8x2xf32, #tpu.memory_space<vmem>>, vector<8x2xf32>,
    return
  }
}

</mosaic_0001>

<bundles_post_ra>
// kernel: tpu_custom_call.1
= control target key start
LH: loop header
LB: loop body
LE: loop exit
PB: predicated region body
PF: predicated region fallthrough
CT: control target
= control target key end

     0   :  { %10 = vsyncpa [#allocation3], 0  ;;  %s1966_s0 = inlined_call_operand.hbm [shape: f32[8,32], index: 0, kind: input, shape index: {}]   ;;  %s1967_s1 = inlined_call_operand.hbm [shape: f32[20,32], index: 1, kind: input, shape index: {}]   ;;  %s1968_s2 = inlined_call_operand.vmem [shape: f32[32,32], index: 2, kind: input, shape index: {}]   ;;  %s1969_s3 = inlined_call_operand.hbm [shape: f32[32,32], index: 3, kind: input, shape index: {}]   ;;  %s1970_s4 = inlined_call_operand.vmem [shape: f32[32,2], index: 4, kind: input, shape index: {}]   ;;  %s1971_s5 = inlined_call_operand.vmem [shape: f32[8,2], index: 5, kind: output, shape index: {}]  }
   0x1   :  { %11 = vsyncpa [#allocation5], 0  ;;  %s27_s20 = sshll.u32 %s1967_s1, 4  ;;  %s1595_s21 = smov [#allocation4]   ;;  %s28_s20 = int_to_ptr.hbm [resolvable:$true] %s27_s20 }
   0x2   :  { %s29_s22 = sshll.u32 %s1595_s21, 4  ;;  %s17_s25 = sshll.u32 %s1966_s0, 4  ;;  %s30_s22 = int_to_ptr.vmem [resolvable:$true] %s29_s22  ;;  %s18_s25 = int_to_ptr.hbm [resolvable:$true] %s17_s25 }
   0x3   :  { %s1596_s26 = smov 128   ;;  %s1597_s27 = smov 8  }
   0x4   :  { %35 = dma.hbm_to_vmem [thread:$0]  %s28_s20, 384, %s30_s22, [#allocation5], %s1596_s26, %s1596_s26, %s1597_s27  }
   0x5   :  { %s1598_s28 = smov [#allocation2]   ;;  %s42_s7 = sshll.u32 %s1969_s3, 4  ;;  %s43_s7 = int_to_ptr.hbm [resolvable:$true] %s42_s7 }
   0x6   :  { %s19_s29 = sshll.u32 %s1598_s28, 4  ;;  %s1599_s1 = smov [#allocation6]   ;;  %s20_s29 = int_to_ptr.vmem [resolvable:$true] %s19_s29 }
   0x7   :  { %22 = dma.hbm_to_vmem [thread:$0]  %s18_s25, 128, %s20_s29, [#allocation3]  }
   0x8   :  { %s44_s8 = sshll.u32 %s1599_s1, 4  ;;  %s45_s8 = int_to_ptr.vmem [resolvable:$true] %s44_s8 }
   0x9   :  { %50 = dma.hbm_to_vmem [thread:$0]  %s43_s7, 512, %s45_s8, [#allocation5], %s1596_s26, %s1596_s26, %s1597_s27  }
   0xa   :  { %1591 = dma.done.wait [#allocation3], 128  }
   0xb   :  { %1592 = vsyncadd [#allocation3], 4294967168 }
   0xc   :  { %1593 = dma.done.wait [#allocation5], 896  }
   0xd   :  { %1594 = vsyncadd [#allocation5], 4294966400  ;;  %v1643_v0 = vld [vmem:[%s1968_s2 + $0x18] sm:$0xff]  ;;  %v1650_v2 = vld [vmem:[%s1968_s2 + $0x10] sm:$0xff]  ;;  %v1600_v11 = vmov 0.0   ;;  %vm79_vm1 = vcmask 261120  }
   0xe   :  { %v1645_v1 = vld [vmem:[#allocation6 + $0x18] sm:$0xff]  ;;  %95 = vmatpush.msra.mxu0 %v1643_v0  ;;  %v1654_v3 = vld [vmem:[#allocation6 + $0x10] sm:$0xff]  ;;  %148 = vmatpush.msra.mxu2 %v1643_v0  ;;  %v1660_v4 = vld [vmem:[%s1968_s2 + $0x8] sm:$0xff] }
   0xf   :  { %116 = vmatpush.msra.mxu1 %v1645_v1  ;;  %v1662_v5 = vld [vmem:[#allocation6 + $0x8] sm:$0xff]  ;;  %v65_v6 = vld [vmem:[#allocation2] sm:$0xff]  ;;  %178 = vmatpush.msra.mxu3 %v1645_v1 }
  0x10   :  { %96 = vmatpush.msra.mxu0 %v1650_v2  ;;  %v1670_v7 = vld [vmem:[%s1968_s2] sm:$0xff]  ;;  %v125_v9 = vadd.f32 -0.9025, %v65_v6  ;;  %149 = vmatpush.msra.mxu2 %v1650_v2  ;;  %v1500_v13 = vld [vmem:[#allocation4] ss:$0 sm:$0xff] }
  0x11   :  { %117 = vmatpush.msra.mxu1 %v1654_v3  ;;  %v1672_v8 = vld [vmem:[#allocation6] sm:$0xff]  ;;  %179 = vmatpush.msra.mxu3 %v1654_v3  ;;  %v1501_v21 = vld [vmem:[#allocation4 + $0x1] ss:$0 sm:$0xff]  ;;  %v1502_v23 = vld [vmem:[#allocation4 + $0x2] ss:$0 sm:$0xff] }
  0x12   :  { %97 = vmatpush.msra.mxu0 %v1660_v4  ;;  %150 = vmatpush.msra.mxu2 %v1660_v4  ;;  %v1364_v10 = vadd.f32 -1.0, %v125_v9  ;;  %v193_v20 = vmul.f32 0.95, %v125_v9  ;;  %v1503_v46 = vld [vmem:[#allocation4 + $0x3] ss:$0 sm:$0xff] }
  0x13   :  { %118 = vmatpush.msra.mxu1 %v1662_v5  ;;  %180 = vmatpush.msra.mxu3 %v1662_v5 }
  0x14   :  { %98 = vmatpush.msra.mxu0 %v1670_v7  ;;  %151 = vmatpush.msra.mxu2 %v1670_v7  ;;  %vm198_vm0 = vcmp.gt.f32.partialorder %v1364_v10, 0.0 }
  0x15   :  { %119 = vmatpush.msra.mxu1 %v1672_v8  ;;  %99 = vmatmul.f32.vlgmr.msra.gmra.mxu0 %v1600_v11  ;;  %v1696_v12 = vsel %vm198_vm0, 1.0, %v1600_v11 }
  0x16   :  { %120 = vmatmul.f32.vlgmr.msra.gmra.mxu1 %v1600_v11  ;;  %152 = vmatmul.f32.vlgmr.msra.gmra.mxu2 %v1600_v11  ;;  %v267_v49 = vmul.f32 -1.0, %v1696_v12 }
  0x17   :  { %218 = vmatpush.msrb.mxu0 %v1643_v0  ;;  %290 = vmatpush.msrb.mxu2 %v1643_v0 }
  0x18   :  { %181 = vmatpush.msra.mxu3 %v1672_v8  ;;  %249 = vmatpush.msrb.mxu1 %v1645_v1 }
  0x19   :  { %219 = vmatpush.msrb.mxu0 %v1650_v2  ;;  %291 = vmatpush.msrb.mxu2 %v1650_v2 }
  0x1a   :  { %250 = vmatpush.msrb.mxu1 %v1654_v3  ;;  %321 = vmatpush.msrb.mxu3 %v1645_v1 }
  0x1b   :  { %220 = vmatpush.msrb.mxu0 %v1660_v4  ;;  %292 = vmatpush.msrb.mxu2 %v1660_v4 }
  0x1c   :  { %251 = vmatpush.msrb.mxu1 %v1662_v5  ;;  %322 = vmatpush.msrb.mxu3 %v1654_v3 }
  0x1d   :  { %221 = vmatpush.msrb.mxu0 %v1670_v7  ;;  %293 = vmatpush.msrb.mxu2 %v1670_v7 }
  0x1e   :  { %1366 = vmatmul.msk.f32.vlgmr.msrb.gmra.mxu0 %vm79_vm1, %v1696_v12  ;;  %252 = vmatpush.msrb.mxu1 %v1672_v8 }
  0x1f   :  { %323 = vmatpush.msrb.mxu3 %v1662_v5  ;;  %362 = vmatpush.msra.mxu0 %v1643_v0 }
  0x20   :  { %393 = vmatpush.msra.mxu1 %v1645_v1  ;;  %434 = vmatpush.msra.mxu2 %v1643_v0 }
  0x21   :  { %324 = vmatpush.msrb.mxu3 %v1672_v8  ;;  %363 = vmatpush.msra.mxu0 %v1650_v2 }
  0x22   :  { %394 = vmatpush.msra.mxu1 %v1654_v3  ;;  %435 = vmatpush.msra.mxu2 %v1650_v2 }
  0x23   :  { %364 = vmatpush.msra.mxu0 %v1660_v4 }
  0x24   :  { %395 = vmatpush.msra.mxu1 %v1662_v5  ;;  %436 = vmatpush.msra.mxu2 %v1660_v4 }
  0x25   :  { %365 = vmatpush.msra.mxu0 %v1670_v7 }
  0x26   :  { %396 = vmatpush.msra.mxu1 %v1672_v8  ;;  %437 = vmatpush.msra.mxu2 %v1670_v7 }
  0x27   :  { %506 = vmatpush.msrb.mxu0 %v1643_v0 }
  0x29   :  { %507 = vmatpush.msrb.mxu0 %v1650_v2 }
  0x2b   :  { %508 = vmatpush.msrb.mxu0 %v1660_v4 }
  0x2d   :  { %509 = vmatpush.msrb.mxu0 %v1670_v7 }
  0x92   :  { %v100_v14 = vpop.f32.mrf.mxu0 }
  0x93   :  { %v101_v15 = vadd.f32 %v1500_v13, %v100_v14  ;;  %v121_v16 = vpop.f32.mrf.mxu1 }
  0x94   :  { %v122_v17 = vadd.f32 -0.95, %v121_v16 }
  0x95   :  { %v103_v18 = vadd.f32 -0.95, %v101_v15 }
  0x96   :  { %v1362_v19 = vadd.f32 -1.0, %v122_v17  ;;  %v186_v43 = vmul.f32 0.95, %v122_v17 }
  0x97   :  { %v1359_v22 = vadd.f32 -1.0, %v103_v18  ;;  %v156_v26 = vmul.f32 0.95, %v103_v18 }
  0x98   :  { %vm190_vm2 = vcmp.gt.f32.partialorder %v1362_v19, 0.0 }
  0x99   :  { %v1363_v24 = vsel %vm190_vm2, 1.0, %v1600_v11  ;;  %v153_v25 = vpop.f32.mrf.mxu2  ;;  %vm160_vm3 = vcmp.gt.f32.partialorder %v1359_v22, 0.0 }
  0x9a   :  { %v194_v27 = vadd.f32 %v1363_v24, %v193_v20  ;;  %v154_v28 = vadd.f32 %v1501_v21, %v153_v25  ;;  %v1360_v29 = vsel %vm160_vm3, 1.0, %v1600_v11  ;;  %v259_v53 = vmul.f32 -1.0, %v1363_v24 }
  0x9b   :  { %1361 = vmatmul.msk.f32.vlgmr.msra.gmra.mxu3 %vm79_vm1, %v1360_v29  ;;  %v223_v30 = vpop.f32.mrf.mxu0  ;;  %v228_v37 = vmul.f32 -1.0, %v1360_v29 }
  0x9c   :  { %v157_v31 = vadd.f32 %v156_v26, %v154_v28  ;;  %v224_v32 = vadd.f32 %v1502_v23, %v223_v30  ;;  %v1372_v33 = vadd.f32 -1.0, %v194_v27  ;;  %465 = vmatpush.msra.mxu3 %v1645_v1  ;;  %v265_v51 = vmul.f32 0.95, %v194_v27 }
  0x9e   :  { %v1367_v34 = vadd.f32 -1.0, %v157_v31  ;;  %v226_v35 = vmul.f32 0.95, %v157_v31  ;;  %vm270_vm4 = vcmp.gt.f32.partialorder %v1372_v33, 0.0  ;;  %466 = vmatpush.msra.mxu3 %v1654_v3 }
  0x9f   :  { %v1373_v36 = vsel %vm270_vm4, 1.0, %v1600_v11 }
  0xa0   :  { %v227_v38 = vadd.f32 %v226_v35, %v224_v32  ;;  %1374 = vmatmul.msk.f32.vlgmr.msrb.gmra.mxu2 %vm79_vm1, %v1373_v36  ;;  %vm231_vm5 = vcmp.gt.f32.partialorder %v1367_v34, 0.0  ;;  %467 = vmatpush.msra.mxu3 %v1662_v5  ;;  %v339_v15 = vmul.f32 -1.0, %v1373_v36  ;;  %v1504_v34 = vld [vmem:[#allocation4 + $0x4] ss:$0 sm:$0xff] }
  0xa1   :  { %v1368_v39 = vsel %vm231_vm5, 1.0, %v1600_v11  ;;  %578 = vmatpush.msrb.mxu2 %v1643_v0 }
  0xa2   :  { %v229_v40 = vadd.f32 %v228_v37, %v227_v38  ;;  %1369 = vmatmul.msk.f32.vlgmr.msrb.gmra.mxu1 %vm79_vm1, %v1368_v39  ;;  %468 = vmatpush.msra.mxu3 %v1672_v8  ;;  %v300_v60 = vmul.f32 -1.0, %v1368_v39 }
  0xa3   :  { %579 = vmatpush.msrb.mxu2 %v1650_v2  ;;  %537 = vmatpush.msrb.mxu1 %v1645_v1 }
  0xa4   :  { %v1375_v41 = vadd.f32 -1.0, %v229_v40  ;;  %v298_v57 = vmul.f32 0.95, %v229_v40 }
  0xa5   :  { %580 = vmatpush.msrb.mxu2 %v1660_v4  ;;  %538 = vmatpush.msrb.mxu1 %v1654_v3 }
  0xa6   :  { %vm303_vm6 = vcmp.gt.f32.partialorder %v1375_v41, 0.0 }
  0xa7   :  { %v1741_v42 = vsel %vm303_vm6, 1.0, %v1600_v11  ;;  %581 = vmatpush.msrb.mxu2 %v1670_v7  ;;  %539 = vmatpush.msrb.mxu1 %v1662_v5 }
  0xa8   :  { %1377 = vmatmul.msk.f32.vlgmr.msrb.gmra.mxu3 %vm79_vm1, %v1741_v42 }
  0xa9   :  { %540 = vmatpush.msrb.mxu1 %v1672_v8  ;;  %609 = vmatpush.msrb.mxu3 %v1645_v1 }
  0xab   :  { %610 = vmatpush.msrb.mxu3 %v1654_v3 }
  0xad   :  { %611 = vmatpush.msrb.mxu3 %v1662_v5 }
  0xaf   :  { %612 = vmatpush.msrb.mxu3 %v1672_v8 }
 0x11e   :  { %v183_v44 = vpop.f32.mrf.mxu3 }
 0x11f   :  { %v187_v45 = vadd.f32 %v186_v43, %v183_v44  ;;  %v254_v50 = vpop.f32.mrf.mxu1  ;;  %v372_v43 = vmul.f32 -1.0, %v1741_v42 }
 0x121   :  { %v1370_v47 = vadd.f32 -1.0, %v187_v45  ;;  %v257_v48 = vmul.f32 0.95, %v187_v45 }
 0x123   :  { %vm262_vm7 = vcmp.gt.f32.partialorder %v1370_v47, 0.0  ;;  %v258_v52 = vadd.f32 %v257_v48, %v254_v50  ;;  %v295_v54 = vpop.f32.mrf.mxu2 }
 0x124   :  { %v1371_v55 = vsel %vm262_vm7, 1.0, %v1600_v11  ;;  %v296_v56 = vadd.f32 %v1503_v46, %v295_v54 }
 0x125   :  { %v266_v58 = vadd.f32 %v1371_v55, %v265_v51  ;;  %v260_v59 = vadd.f32 %v259_v53, %v258_v52  ;;  %v331_v19 = vmul.f32 -1.0, %v1371_v55  ;;  %v1505_v51 = vld [vmem:[#allocation4 + $0x5] ss:$0 sm:$0xff] }
 0x126   :  { %v299_v61 = vadd.f32 %v298_v57, %v296_v56 }
 0x127   :  { %v268_v62 = vadd.f32 %v267_v49, %v266_v58  ;;  %v1378_v63 = vadd.f32 -1.0, %v260_v59  ;;  %v329_v14 = vmul.f32 0.95, %v260_v59 }
 0x128   :  { %v301_v6 = vadd.f32 %v300_v60, %v299_v61  ;;  %v1506_v61 = vld [vmem:[#allocation4 + $0x6] ss:$0 sm:$0xff] }
 0x129   :  { %vm334_vm8 = vcmp.gt.f32.partialorder %v1378_v63, 0.0  ;;  %v337_v9 = vmul.f32 0.95, %v268_v62  ;;  %v1380_v10 = vadd.f32 -1.0, %v268_v62 }
 0x12a   :  { %v1379_v12 = vsel %vm334_vm8, 1.0, %v1600_v11  ;;  %v1383_v13 = vadd.f32 -1.0, %v301_v6  ;;  %v370_v38 = vmul.f32 0.95, %v301_v6 }
 0x12b   :  { %v338_v16 = vadd.f32 %v1379_v12, %v337_v9  ;;  %v326_v17 = vpop.f32.mrf.mxu3  ;;  %vm342_vm9 = vcmp.gt.f32.partialorder %v1380_v10, 0.0  ;;  %v403_v41 = vmul.f32 -1.0, %v1379_v12 }
 0x12c   :  { %v330_v18 = vadd.f32 %v329_v14, %v326_v17  ;;  %v1381_v20 = vsel %vm342_vm9, 1.0, %v1600_v11  ;;  %vm375_vm10 = vcmp.gt.f32.partialorder %v1383_v13, 0.0 }
 0x12d   :  { %v340_v21 = vadd.f32 %v339_v15, %v338_v16  ;;  %1382 = vmatmul.msk.f32.vlgmr.msra.gmra.mxu0 %vm79_vm1, %v1381_v20  ;;  %v1758_v22 = vsel %vm375_vm10, 1.0, %v1600_v11  ;;  %v411_v30 = vmul.f32 -1.0, %v1381_v20 }
 0x12e   :  { %v332_v23 = vadd.f32 %v331_v19, %v330_v18  ;;  %1385 = vmatmul.msk.f32.vlgmr.msra.gmra.mxu1 %vm79_vm1, %v1758_v22  ;;  %650 = vmatpush.msra.mxu0 %v1643_v0  ;;  %v444_v60 = vmul.f32 -1.0, %v1758_v22 }
 0x12f   :  { %v1388_v24 = vadd.f32 -1.0, %v340_v21  ;;  %681 = vmatpush.msra.mxu1 %v1645_v1  ;;  %v409_v26 = vmul.f32 0.95, %v340_v21 }
 0x130   :  { %v1386_v25 = vadd.f32 -1.0, %v332_v23  ;;  %651 = vmatpush.msra.mxu0 %v1650_v2  ;;  %v401_v36 = vmul.f32 0.95, %v332_v23 }
 0x131   :  { %vm414_vm11 = vcmp.gt.f32.partialorder %v1388_v24, 0.0  ;;  %682 = vmatpush.msra.mxu1 %v1654_v3  ;;  %v1507_v24 = vld [vmem:[#allocation4 + $0x7] ss:$0 sm:$0xff] }
 0x132   :  { %vm406_vm12 = vcmp.gt.f32.partialorder %v1386_v25, 0.0  ;;  %v1389_v27 = vsel %vm414_vm11, 1.0, %v1600_v11  ;;  %652 = vmatpush.msra.mxu0 %v1660_v4 }
 0x133   :  { %v1769_v28 = vsel %vm406_vm12, 1.0, %v1600_v11  ;;  %1390 = vmatmul.msk.f32.vlgmr.msra.gmra.mxu2 %vm79_vm1, %v1389_v27  ;;  %683 = vmatpush.msra.mxu1 %v1662_v5  ;;  %v483_v52 = vmul.f32 -1.0, %v1389_v27 }
 0x134   :  { %v410_v29 = vadd.f32 %v1769_v28, %v409_v26  ;;  %653 = vmatpush.msra.mxu0 %v1670_v7  ;;  %722 = vmatpush.msra.mxu2 %v1643_v0  ;;  %v475_v22 = vmul.f32 -1.0, %v1769_v28 }
 0x135   :  { %684 = vmatpush.msra.mxu1 %v1672_v8 }
 0x136   :  { %v412_v31 = vadd.f32 %v411_v30, %v410_v29  ;;  %723 = vmatpush.msra.mxu2 %v1650_v2 }
 0x138   :  { %v1396_v32 = vadd.f32 -1.0, %v412_v31  ;;  %724 = vmatpush.msra.mxu2 %v1660_v4  ;;  %v481_v49 = vmul.f32 0.95, %v412_v31 }
 0x13a   :  { %vm486_vm13 = vcmp.gt.f32.partialorder %v1396_v32, 0.0  ;;  %725 = vmatpush.msra.mxu2 %v1670_v7 }
 0x13b   :  { %v1781_v33 = vsel %vm486_vm13, 1.0, %v1600_v11 }
 0x13c   :  { %1398 = vmatmul.msk.f32.vlgmr.msrb.gmra.mxu0 %vm79_vm1, %v1781_v33 }
 0x13d   :  { %794 = vmatpush.msrb.mxu0 %v1643_v0 }
 0x13f   :  { %795 = vmatpush.msrb.mxu0 %v1650_v2 }
 0x141   :  { %796 = vmatpush.msrb.mxu0 %v1660_v4 }
 0x143   :  { %797 = vmatpush.msrb.mxu0 %v1670_v7 }
 0x1aa   :  { %v367_v35 = vpop.f32.mrf.mxu0 }
 0x1ab   :  { %v368_v37 = vadd.f32 %v1504_v34, %v367_v35  ;;  %v398_v39 = vpop.f32.mrf.mxu1 }
 0x1ac   :  { %v402_v40 = vadd.f32 %v401_v36, %v398_v39 }
 0x1ad   :  { %v371_v44 = vadd.f32 %v370_v38, %v368_v37  ;;  %v555_v37 = vmul.f32 -1.0, %v1781_v33 }
 0x1ae   :  { %v404_v45 = vadd.f32 %v403_v41, %v402_v40 }
 0x1af   :  { %v373_v46 = vadd.f32 %v372_v43, %v371_v44 }
 0x1b0   :  { %v1394_v47 = vadd.f32 -1.0, %v404_v45  ;;  %v473_v19 = vmul.f32 0.95, %v404_v45 }
 0x1b1   :  { %v1391_v48 = vadd.f32 -1.0, %v373_v46  ;;  %v442_v57 = vmul.f32 0.95, %v373_v46 }
 0x1b2   :  { %vm478_vm14 = vcmp.gt.f32.partialorder %v1394_v47, 0.0 }
 0x1b3   :  { %v1395_v50 = vsel %vm478_vm14, 1.0, %v1600_v11  ;;  %vm447_vm15 = vcmp.gt.f32.partialorder %v1391_v48, 0.0 }
 0x1b4   :  { %v482_v53 = vadd.f32 %v1395_v50, %v481_v49  ;;  %v1392_v54 = vsel %vm447_vm15, 1.0, %v1600_v11  ;;  %v547_v31 = vmul.f32 -1.0, %v1395_v50 }
 0x1b5   :  { %1393 = vmatmul.msk.f32.vlgmr.msra.gmra.mxu3 %vm79_vm1, %v1392_v54  ;;  %v516_v14 = vmul.f32 -1.0, %v1392_v54 }
 0x1b6   :  { %v484_v55 = vadd.f32 %v483_v52, %v482_v53  ;;  %v439_v56 = vpop.f32.mrf.mxu2  ;;  %753 = vmatpush.msra.mxu3 %v1645_v1 }
 0x1b7   :  { %v440_v42 = vadd.f32 %v1505_v51, %v439_v56 }
 0x1b8   :  { %v1404_v58 = vadd.f32 -1.0, %v484_v55  ;;  %754 = vmatpush.msra.mxu3 %v1654_v3  ;;  %v553_v29 = vmul.f32 0.95, %v484_v55 }
 0x1b9   :  { %v443_v59 = vadd.f32 %v442_v57, %v440_v42  ;;  %v511_v62 = vpop.f32.mrf.mxu0 }
 0x1ba   :  { %vm558_vm0 = vcmp.gt.f32.partialorder %v1404_v58, 0.0  ;;  %755 = vmatpush.msra.mxu3 %v1662_v5  ;;  %v512_v10 = vadd.f32 %v1506_v61, %v511_v62 }
 0x1bb   :  { %v445_v63 = vadd.f32 %v444_v60, %v443_v59  ;;  %v1405_v6 = vsel %vm558_vm0, 1.0, %v1600_v11 }
 0x1bc   :  { %1406 = vmatmul.msk.f32.vlgmr.msrb.gmra.mxu2 %vm79_vm1, %v1405_v6  ;;  %756 = vmatpush.msra.mxu3 %v1672_v8  ;;  %v627_v49 = vmul.f32 -1.0, %v1405_v6 }
 0x1bd   :  { %v1399_v9 = vadd.f32 -1.0, %v445_v63  ;;  %v514_v12 = vmul.f32 0.95, %v445_v63  ;;  %866 = vmatpush.msrb.mxu2 %v1643_v0 }
 0x1bf   :  { %v515_v13 = vadd.f32 %v514_v12, %v512_v10  ;;  %vm519_vm2 = vcmp.gt.f32.partialorder %v1399_v9, 0.0  ;;  %867 = vmatpush.msrb.mxu2 %v1650_v2  ;;  %v1508_v12 = vld [vmem:[#allocation4 + $0x8] ss:$0 sm:$0xff] }
 0x1c0   :  { %v1400_v15 = vsel %vm519_vm2, 1.0, %v1600_v11 }
 0x1c1   :  { %v517_v16 = vadd.f32 %v516_v14, %v515_v13  ;;  %1401 = vmatmul.msk.f32.vlgmr.msrb.gmra.mxu1 %vm79_vm1, %v1400_v15  ;;  %868 = vmatpush.msrb.mxu2 %v1660_v4  ;;  %v588_v28 = vmul.f32 -1.0, %v1400_v15 }
 0x1c2   :  { %825 = vmatpush.msrb.mxu1 %v1645_v1 }
 0x1c3   :  { %v1407_v17 = vadd.f32 -1.0, %v517_v16  ;;  %869 = vmatpush.msrb.mxu2 %v1670_v7  ;;  %v586_v36 = vmul.f32 0.95, %v517_v16 }
 0x1c4   :  { %826 = vmatpush.msrb.mxu1 %v1654_v3 }
 0x1c5   :  { %vm591_vm3 = vcmp.gt.f32.partialorder %v1407_v17, 0.0 }
 0x1c6   :  { %v1809_v18 = vsel %vm591_vm3, 1.0, %v1600_v11  ;;  %827 = vmatpush.msrb.mxu1 %v1662_v5 }
 0x1c7   :  { %1409 = vmatmul.msk.f32.vlgmr.msrb.gmra.mxu3 %vm79_vm1, %v1809_v18 }
 0x1c8   :  { %828 = vmatpush.msrb.mxu1 %v1672_v8  ;;  %897 = vmatpush.msrb.mxu3 %v1645_v1 }
 0x1ca   :  { %898 = vmatpush.msrb.mxu3 %v1654_v3 }
 0x1cc   :  { %899 = vmatpush.msrb.mxu3 %v1662_v5 }
 0x1ce   :  { %900 = vmatpush.msrb.mxu3 %v1672_v8 }
 0x238   :  { %v470_v20 = vpop.f32.mrf.mxu3 }
 0x239   :  { %v474_v21 = vadd.f32 %v473_v19, %v470_v20 }
 0x23b   :  { %v476_v23 = vadd.f32 %v475_v22, %v474_v21  ;;  %v660_v22 = vmul.f32 -1.0, %v1809_v18 }
 0x23d   :  { %v1402_v25 = vadd.f32 -1.0, %v476_v23  ;;  %v545_v26 = vmul.f32 0.95, %v476_v23 }
 0x23e   :  { %v542_v27 = vpop.f32.mrf.mxu1 }
 0x23f   :  { %vm550_vm4 = vcmp.gt.f32.partialorder %v1402_v25, 0.0  ;;  %v546_v30 = vadd.f32 %v545_v26, %v542_v27  ;;  %v583_v32 = vpop.f32.mrf.mxu2 }
 0x240   :  { %v1403_v34 = vsel %vm550_vm4, 1.0, %v1600_v11  ;;  %v584_v35 = vadd.f32 %v1507_v24, %v583_v32 }
 0x241   :  { %v554_v38 = vadd.f32 %v1403_v34, %v553_v29  ;;  %v548_v39 = vadd.f32 %v547_v31, %v546_v30  ;;  %v619_v56 = vmul.f32 -1.0, %v1403_v34  ;;  %v1509_v30 = vld [vmem:[#allocation4 + $0x9] ss:$0 sm:$0xff] }
 0x242   :  { %v587_v40 = vadd.f32 %v586_v36, %v584_v35 }
 0x243   :  { %v556_v41 = vadd.f32 %v555_v37, %v554_v38  ;;  %v1410_v43 = vadd.f32 -1.0, %v548_v39  ;;  %v617_v53 = vmul.f32 0.95, %v548_v39 }
 0x244   :  { %v589_v44 = vadd.f32 %v588_v28, %v587_v40  ;;  %v1510_v28 = vld [vmem:[#allocation4 + $0xa] ss:$0 sm:$0xff] }
 0x245   :  { %vm622_vm5 = vcmp.gt.f32.partialorder %v1410_v43, 0.0  ;;  %v625_v45 = vmul.f32 0.95, %v556_v41  ;;  %v1412_v46 = vadd.f32 -1.0, %v556_v41 }
 0x246   :  { %v1411_v47 = vsel %vm622_vm5, 1.0, %v1600_v11  ;;  %v1415_v48 = vadd.f32 -1.0, %v589_v44  ;;  %v658_v16 = vmul.f32 0.95, %v589_v44 }
 0x247   :  { %v626_v50 = vadd.f32 %v1411_v47, %v625_v45  ;;  %vm630_vm6 = vcmp.gt.f32.partialorder %v1412_v46, 0.0  ;;  %v691_v20 = vmul.f32 -1.0, %v1411_v47 }
 0x248   :  { %v1413_v51 = vsel %vm630_vm6, 1.0, %v1600_v11  ;;  %vm663_vm7 = vcmp.gt.f32.partialorder %v1415_v48, 0.0 }
 0x249   :  { %v628_v33 = vadd.f32 %v627_v49, %v626_v50  ;;  %1414 = vmatmul.msk.f32.vlgmr.msra.gmra.mxu0 %vm79_vm1, %v1413_v51  ;;  %v1826_v52 = vsel %vm663_vm7, 1.0, %v1600_v11  ;;  %v699_v62 = vmul.f32 -1.0, %v1413_v51 }
 0x24a   :  { %1417 = vmatmul.msk.f32.vlgmr.msra.gmra.mxu1 %vm79_vm1, %v1826_v52  ;;  %v614_v54 = vpop.f32.mrf.mxu3  ;;  %938 = vmatpush.msra.mxu0 %v1643_v0  ;;  %v732_v40 = vmul.f32 -1.0, %v1826_v52 }
 0x24b   :  { %v618_v55 = vadd.f32 %v617_v53, %v614_v54  ;;  %v1420_v42 = vadd.f32 -1.0, %v628_v33  ;;  %969 = vmatpush.msra.mxu1 %v1645_v1  ;;  %v697_v60 = vmul.f32 0.95, %v628_v33 }
 0x24c   :  { %939 = vmatpush.msra.mxu0 %v1650_v2 }
 0x24d   :  { %v620_v57 = vadd.f32 %v619_v56, %v618_v55  ;;  %vm702_vm8 = vcmp.gt.f32.partialorder %v1420_v42, 0.0  ;;  %970 = vmatpush.msra.mxu1 %v1654_v3 }
 0x24e   :  { %v1421_v58 = vsel %vm702_vm8, 1.0, %v1600_v11  ;;  %940 = vmatpush.msra.mxu0 %v1660_v4 }
 0x24f   :  { %v1418_v59 = vadd.f32 -1.0, %v620_v57  ;;  %1422 = vmatmul.msk.f32.vlgmr.msra.gmra.mxu2 %vm79_vm1, %v1421_v58  ;;  %971 = vmatpush.msra.mxu1 %v1662_v5  ;;  %v689_v14 = vmul.f32 0.95, %v620_v57  ;;  %v771_v31 = vmul.f32 -1.0, %v1421_v58  ;;  %v1511_v57 = vld [vmem:[#allocation4 + $0xb] ss:$0 sm:$0xff] }
 0x250   :  { %1010 = vmatpush.msra.mxu2 %v1643_v0  ;;  %941 = vmatpush.msra.mxu0 %v1670_v7 }
 0x251   :  { %vm694_vm9 = vcmp.gt.f32.partialorder %v1418_v59, 0.0  ;;  %972 = vmatpush.msra.mxu1 %v1672_v8 }
 0x252   :  { %v1842_v61 = vsel %vm694_vm9, 1.0, %v1600_v11  ;;  %1011 = vmatpush.msra.mxu2 %v1650_v2 }
 0x253   :  { %v698_v63 = vadd.f32 %v1842_v61, %v697_v60  ;;  %v763_v56 = vmul.f32 -1.0, %v1842_v61 }
 0x254   :  { %1012 = vmatpush.msra.mxu2 %v1660_v4 }
 0x255   :  { %v700_v6 = vadd.f32 %v699_v62, %v698_v63 }
 0x256   :  { %1013 = vmatpush.msra.mxu2 %v1670_v7 }
 0x257   :  { %v1428_v9 = vadd.f32 -1.0, %v700_v6  ;;  %v769_v27 = vmul.f32 0.95, %v700_v6 }
 0x259   :  { %vm774_vm10 = vcmp.gt.f32.partialorder %v1428_v9, 0.0 }
 0x25a   :  { %v1849_v10 = vsel %vm774_vm10, 1.0, %v1600_v11 }
 0x25b   :  { %1430 = vmatmul.msk.f32.vlgmr.msrb.gmra.mxu0 %vm79_vm1, %v1849_v10 }
 0x25c   :  { %1082 = vmatpush.msrb.mxu0 %v1643_v0 }
 0x25e   :  { %1083 = vmatpush.msrb.mxu0 %v1650_v2 }
 0x260   :  { %1084 = vmatpush.msrb.mxu0 %v1660_v4 }
 0x262   :  { %1085 = vmatpush.msrb.mxu0 %v1670_v7 }
 0x2c6   :  { %v655_v13 = vpop.f32.mrf.mxu0 }
 0x2c7   :  { %v656_v15 = vadd.f32 %v1508_v12, %v655_v13  ;;  %v686_v17 = vpop.f32.mrf.mxu1 }
 0x2c8   :  { %v690_v19 = vadd.f32 %v689_v14, %v686_v17 }
 0x2c9   :  { %v659_v21 = vadd.f32 %v658_v16, %v656_v15 }
 0x2ca   :  { %v692_v23 = vadd.f32 %v691_v20, %v690_v19 }
 0x2cb   :  { %v661_v24 = vadd.f32 %v660_v22, %v659_v21 }
 0x2cc   :  { %v1426_v25 = vadd.f32 -1.0, %v692_v23  ;;  %v761_v53 = vmul.f32 0.95, %v692_v23 }
 0x2cd   :  { %v1423_v26 = vadd.f32 -1.0, %v661_v24  ;;  %v730_v37 = vmul.f32 0.95, %v661_v24 }
 0x2ce   :  { %vm766_vm11 = vcmp.gt.f32.partialorder %v1426_v25, 0.0 }
 0x2cf   :  { %v1427_v29 = vsel %vm766_vm11, 1.0, %v1600_v11  ;;  %vm735_vm12 = vcmp.gt.f32.partialorder %v1423_v26, 0.0 }
 0x2d0   :  { %v770_v32 = vadd.f32 %v1427_v29, %v769_v27  ;;  %v1424_v34 = vsel %vm735_vm12, 1.0, %v1600_v11  ;;  %v835_v63 = vmul.f32 -1.0, %v1427_v29 }
 0x2d1   :  { %1425 = vmatmul.msk.f32.vlgmr.msra.gmra.mxu3 %vm79_vm1, %v1424_v34  ;;  %v804_v49 = vmul.f32 -1.0, %v1424_v34 }
 0x2d2   :  { %v772_v35 = vadd.f32 %v771_v31, %v770_v32  ;;  %v727_v36 = vpop.f32.mrf.mxu2  ;;  %1041 = vmatpush.msra.mxu3 %v1645_v1 }
 0x2d3   :  { %v728_v18 = vadd.f32 %v1509_v30, %v727_v36 }
 0x2d4   :  { %v1436_v38 = vadd.f32 -1.0, %v772_v35  ;;  %1042 = vmatpush.msra.mxu3 %v1654_v3 }
 0x2d5   :  { %v731_v39 = vadd.f32 %v730_v37, %v728_v18 }
 0x2d6   :  { %vm846_vm13 = vcmp.gt.f32.partialorder %v1436_v38, 0.0  ;;  %1043 = vmatpush.msra.mxu3 %v1662_v5 }
 0x2d7   :  { %v733_v41 = vadd.f32 %v732_v40, %v731_v39  ;;  %v1437_v43 = vsel %vm846_vm13, 1.0, %v1600_v11 }
 0x2d8   :  { %1438 = vmatmul.msk.f32.vlgmr.msrb.gmra.mxu2 %vm79_vm1, %v1437_v43  ;;  %v799_v44 = vpop.f32.mrf.mxu0  ;;  %1044 = vmatpush.msra.mxu3 %v1672_v8  ;;  %v915_v23 = vmul.f32 -1.0, %v1437_v43 }
 0x2d9   :  { %v1431_v45 = vadd.f32 -1.0, %v733_v41  ;;  %v800_v46 = vadd.f32 %v1510_v28, %v799_v44  ;;  %v802_v47 = vmul.f32 0.95, %v733_v41  ;;  %1154 = vmatpush.msrb.mxu2 %v1643_v0  ;;  %v1512_v41 = vld [vmem:[#allocation4 + $0xc] ss:$0 sm:$0xff] }
 0x2db   :  { %v803_v48 = vadd.f32 %v802_v47, %v800_v46  ;;  %vm807_vm14 = vcmp.gt.f32.partialorder %v1431_v45, 0.0  ;;  %1155 = vmatpush.msrb.mxu2 %v1650_v2 }
 0x2dc   :  { %v1432_v50 = vsel %vm807_vm14, 1.0, %v1600_v11 }
 0x2dd   :  { %v805_v51 = vadd.f32 %v804_v49, %v803_v48  ;;  %1433 = vmatmul.msk.f32.vlgmr.msrb.gmra.mxu1 %vm79_vm1, %v1432_v50  ;;  %1156 = vmatpush.msrb.mxu2 %v1660_v4  ;;  %v876_v61 = vmul.f32 -1.0, %v1432_v50 }
 0x2de   :  { %1113 = vmatpush.msrb.mxu1 %v1645_v1 }
 0x2df   :  { %v1439_v33 = vadd.f32 -1.0, %v805_v51  ;;  %1157 = vmatpush.msrb.mxu2 %v1670_v7  ;;  %v874_v9 = vmul.f32 0.95, %v805_v51 }
 0x2e0   :  { %1114 = vmatpush.msrb.mxu1 %v1654_v3 }
 0x2e1   :  { %vm879_vm15 = vcmp.gt.f32.partialorder %v1439_v33, 0.0 }
 0x2e2   :  { %v1877_v52 = vsel %vm879_vm15, 1.0, %v1600_v11  ;;  %1115 = vmatpush.msrb.mxu1 %v1662_v5 }
 0x2e3   :  { %1441 = vmatmul.msk.f32.vlgmr.msrb.gmra.mxu3 %vm79_vm1, %v1877_v52  ;;  %v948_v49 = vmul.f32 -1.0, %v1877_v52 }
 0x2e4   :  { %1185 = vmatpush.msrb.mxu3 %v1645_v1  ;;  %1116 = vmatpush.msrb.mxu1 %v1672_v8  ;;  %v841_v1 = vmul.f32 0.95, %v772_v35 }
 0x2e6   :  { %1186 = vmatpush.msrb.mxu3 %v1654_v3 }
 0x2e8   :  { %1187 = vmatpush.msrb.mxu3 %v1662_v5 }
 0x2ea   :  { %1188 = vmatpush.msrb.mxu3 %v1672_v8  ;;  %v843_v8 = vmul.f32 -1.0, %v1849_v10 }
 0x354   :  { %v758_v54 = vpop.f32.mrf.mxu3 }
 0x355   :  { %v762_v55 = vadd.f32 %v761_v53, %v758_v54 }
 0x357   :  { %v764_v42 = vadd.f32 %v763_v56, %v762_v55  ;;  %v1513_v55 = vld [vmem:[#allocation4 + $0xd] ss:$0 sm:$0xff] }
 0x359   :  { %v1434_v58 = vadd.f32 -1.0, %v764_v42  ;;  %v833_v59 = vmul.f32 0.95, %v764_v42 }
 0x35a   :  { %v830_v60 = vpop.f32.mrf.mxu1 }
 0x35b   :  { %vm838_vm0 = vcmp.gt.f32.partialorder %v1434_v58, 0.0  ;;  %v834_v62 = vadd.f32 %v833_v59, %v830_v60  ;;  %v871_v6 = vpop.f32.mrf.mxu2 }
 0x35c   :  { %v1435_v3 = vsel %vm838_vm0, 1.0, %v1600_v11  ;;  %v872_v5 = vadd.f32 %v1511_v57, %v871_v6  ;;  %v1514_v6 = vld [vmem:[#allocation4 + $0xe] ss:$0 sm:$0xff] }
 0x35d   :  { %v842_v12 = vadd.f32 %v1435_v3, %v841_v1  ;;  %v836_v13 = vadd.f32 %v835_v63, %v834_v62  ;;  %v907_v31 = vmul.f32 -1.0, %v1435_v3 }
 0x35e   :  { %v875_v14 = vadd.f32 %v874_v9, %v872_v5 }
 0x35f   :  { %v844_v15 = vadd.f32 %v843_v8, %v842_v12  ;;  %v1442_v16 = vadd.f32 -1.0, %v836_v13  ;;  %v905_v27 = vmul.f32 0.95, %v836_v13 }
 0x360   :  { %v877_v17 = vadd.f32 %v876_v61, %v875_v14 }
 0x361   :  { %vm910_vm2 = vcmp.gt.f32.partialorder %v1442_v16, 0.0  ;;  %v913_v19 = vmul.f32 0.95, %v844_v15  ;;  %v1444_v20 = vadd.f32 -1.0, %v844_v15 }
 0x362   :  { %v1443_v21 = vsel %vm910_vm2, 1.0, %v1600_v11  ;;  %v1447_v22 = vadd.f32 -1.0, %v877_v17  ;;  %v946_v45 = vmul.f32 0.95, %v877_v17 }
 0x363   :  { %v914_v24 = vadd.f32 %v1443_v21, %v913_v19  ;;  %vm918_vm3 = vcmp.gt.f32.partialorder %v1444_v20, 0.0  ;;  %v979_v48 = vmul.f32 -1.0, %v1443_v21 }
 0x364   :  { %v1445_v25 = vsel %vm918_vm3, 1.0, %v1600_v11  ;;  %vm951_vm4 = vcmp.gt.f32.partialorder %v1447_v22, 0.0 }
 0x365   :  { %v916_v10 = vadd.f32 %v915_v23, %v914_v24  ;;  %1446 = vmatmul.msk.f32.vlgmr.msra.gmra.mxu0 %vm79_vm1, %v1445_v25  ;;  %v1894_v26 = vsel %vm951_vm4, 1.0, %v1600_v11  ;;  %v987_v38 = vmul.f32 -1.0, %v1445_v25  ;;  %v1515_v25 = vld [vmem:[#allocation4 + $0xf] ss:$0 sm:$0xff] }
 0x366   :  { %1449 = vmatmul.msk.f32.vlgmr.msra.gmra.mxu1 %vm79_vm1, %v1894_v26  ;;  %v902_v29 = vpop.f32.mrf.mxu3  ;;  %1226 = vmatpush.msra.mxu0 %v1643_v0  ;;  %v1020_v63 = vmul.f32 -1.0, %v1894_v26 }
 0x367   :  { %v906_v30 = vadd.f32 %v905_v27, %v902_v29  ;;  %v1452_v32 = vadd.f32 -1.0, %v916_v10  ;;  %1271 = vmatpush.msra.mxu1 %v1643_v0  ;;  %v985_v18 = vmul.f32 0.95, %v916_v10 }
 0x368   :  { %1227 = vmatpush.msra.mxu0 %v1650_v2 }
 0x369   :  { %v908_v34 = vadd.f32 %v907_v31, %v906_v30  ;;  %vm990_vm5 = vcmp.gt.f32.partialorder %v1452_v32, 0.0  ;;  %1272 = vmatpush.msra.mxu1 %v1650_v2 }
 0x36a   :  { %v1453_v35 = vsel %vm990_vm5, 1.0, %v1600_v11  ;;  %1228 = vmatpush.msra.mxu0 %v1660_v4 }
 0x36b   :  { %v1450_v36 = vadd.f32 -1.0, %v908_v34  ;;  %1454 = vmatmul.msk.f32.vlgmr.msra.gmra.mxu2 %vm79_vm1, %v1453_v35  ;;  %1273 = vmatpush.msra.mxu1 %v1660_v4  ;;  %v977_v44 = vmul.f32 0.95, %v908_v34  ;;  %v1059_v56 = vmul.f32 -1.0, %v1453_v35 }
 0x36c   :  { %1229 = vmatpush.msra.mxu0 %v1670_v7  ;;  %1308 = vmatpush.msra.mxu2 %v1643_v0 }
 0x36d   :  { %vm982_vm6 = vcmp.gt.f32.partialorder %v1450_v36, 0.0  ;;  %1274 = vmatpush.msra.mxu1 %v1670_v7 }
 0x36e   :  { %v1910_v37 = vsel %vm982_vm6, 1.0, %v1600_v11  ;;  %1309 = vmatpush.msra.mxu2 %v1650_v2 }
 0x36f   :  { %v986_v39 = vadd.f32 %v1910_v37, %v985_v18  ;;  %v1051_v23 = vmul.f32 -1.0, %v1910_v37 }
 0x370   :  { %1310 = vmatpush.msra.mxu2 %v1660_v4 }
 0x371   :  { %v988_v40 = vadd.f32 %v987_v38, %v986_v39 }
 0x372   :  { %1311 = vmatpush.msra.mxu2 %v1670_v7 }
 0x373   :  { %v1460_v28 = vadd.f32 -1.0, %v988_v40  ;;  %v1057_v53 = vmul.f32 0.95, %v988_v40 }
 0x375   :  { %vm1062_vm7 = vcmp.gt.f32.partialorder %v1460_v28, 0.0 }
 0x376   :  { %v1917_v0 = vsel %vm1062_vm7, 1.0, %v1600_v11  ;;  %vm1351_vm7 = vcmask 15360  }
 0x377   :  { %1462 = vmatmul.msk.f32.vlgmr.msrb.gmra.mxu0 %vm79_vm1, %v1917_v0  ;;  %v1131_v18 = vmul.f32 -1.0, %v1917_v0 }
 0x3e2   :  { %v943_v43 = vpop.f32.mrf.mxu0 }
 0x3e3   :  { %v944_v2 = vadd.f32 %v1512_v41, %v943_v43  ;;  %v974_v46 = vpop.f32.mrf.mxu1 }
 0x3e4   :  { %v978_v47 = vadd.f32 %v977_v44, %v974_v46 }
 0x3e5   :  { %v947_v4 = vadd.f32 %v946_v45, %v944_v2 }
 0x3e6   :  { %v980_v7 = vadd.f32 %v979_v48, %v978_v47 }
 0x3e7   :  { %v949_v50 = vadd.f32 %v948_v49, %v947_v4 }
 0x3e8   :  { %v1458_v51 = vadd.f32 -1.0, %v980_v7  ;;  %v1049_v20 = vmul.f32 0.95, %v980_v7 }
 0x3e9   :  { %v1455_v33 = vadd.f32 -1.0, %v949_v50  ;;  %v1018_v52 = vmul.f32 0.95, %v949_v50 }
 0x3ea   :  { %vm1054_vm8 = vcmp.gt.f32.partialorder %v1458_v51, 0.0 }
 0x3eb   :  { %v1459_v54 = vsel %vm1054_vm8, 1.0, %v1600_v11  ;;  %vm1023_vm9 = vcmp.gt.f32.partialorder %v1455_v33, 0.0 }
 0x3ec   :  { %v1058_v42 = vadd.f32 %v1459_v54, %v1057_v53  ;;  %v1456_v57 = vsel %vm1023_vm9, 1.0, %v1600_v11  ;;  %v1123_v31 = vmul.f32 -1.0, %v1459_v54 }
 0x3ed   :  { %1457 = vmatmul.msk.f32.vlgmr.msra.gmra.mxu3 %vm79_vm1, %v1456_v57  ;;  %v1092_v61 = vmul.f32 -1.0, %v1456_v57 }
 0x3ee   :  { %v1060_v58 = vadd.f32 %v1059_v56, %v1058_v42  ;;  %v1015_v59 = vpop.f32.mrf.mxu2 }
 0x3ef   :  { %v1016_v60 = vadd.f32 %v1513_v55, %v1015_v59 }
 0x3f0   :  { %v1468_v1 = vadd.f32 -1.0, %v1060_v58  ;;  %v1129_v29 = vmul.f32 0.95, %v1060_v58 }
 0x3f1   :  { %v1019_v62 = vadd.f32 %v1018_v52, %v1016_v60  ;;  %v1327_v52 = vld [vmem:[%s1970_s4 + $0x18] sm:$0xff] }
 0x3f2   :  { %vm1134_vm10 = vcmp.gt.f32.partialorder %v1468_v1, 0.0  ;;  %v1516_v1 = vld [vmem:[#allocation4 + $0x10] ss:$0 sm:$0xff]  ;;  %1343 = vmatpush.msra.mxu3 %v1327_v52 }
 0x3f3   :  { %v1021_v3 = vadd.f32 %v1020_v63, %v1019_v62  ;;  %v1469_v5 = vsel %vm1134_vm10, 1.0, %v1600_v11  ;;  %v1326_v62 = vld [vmem:[%s1970_s4 + $0x10] sm:$0xff] }
 0x3f4   :  { %1470 = vmatmul.msk.f32.vlgmr.msrb.gmra.mxu2 %vm79_vm1, %v1469_v5  ;;  %v1087_v9 = vpop.f32.mrf.mxu0  ;;  %v1203_v46 = vmul.f32 -1.0, %v1469_v5  ;;  %1344 = vmatpush.msra.mxu3 %v1326_v62 }
 0x3f5   :  { %v1463_v8 = vadd.f32 -1.0, %v1021_v3  ;;  %v1088_v12 = vadd.f32 %v1514_v6, %v1087_v9  ;;  %v1090_v13 = vmul.f32 0.95, %v1021_v3  ;;  %v1325_v3 = vld [vmem:[%s1970_s4 + $0x8] sm:$0xff] }
 0x3f6   :  { %1345 = vmatpush.msra.mxu3 %v1325_v3 }
 0x3f7   :  { %v1091_v14 = vadd.f32 %v1090_v13, %v1088_v12  ;;  %vm1095_vm11 = vcmp.gt.f32.partialorder %v1463_v8, 0.0  ;;  %v1324_v8 = vld [vmem:[%s1970_s4] sm:$0xff] }
 0x3f8   :  { %v1464_v15 = vsel %vm1095_vm11, 1.0, %v1600_v11  ;;  %1346 = vmatpush.msra.mxu3 %v1324_v8 }
 0x3f9   :  { %v1093_v16 = vadd.f32 %v1092_v61, %v1091_v14  ;;  %1465 = vmatmul.msk.f32.vlgmr.msrb.gmra.mxu1 %vm79_vm1, %v1464_v15  ;;  %v1164_v37 = vmul.f32 -1.0, %v1464_v15  ;;  %v1517_v14 = vld [vmem:[#allocation4 + $0x11] ss:$0 sm:$0xff] }
 0x3fb   :  { %v1471_v17 = vadd.f32 -1.0, %v1093_v16  ;;  %v1162_v36 = vmul.f32 0.95, %v1093_v16 }
 0x3fd   :  { %vm1167_vm12 = vcmp.gt.f32.partialorder %v1471_v17, 0.0 }
 0x3fe   :  { %v1931_v19 = vsel %vm1167_vm12, 1.0, %v1600_v11 }
 0x3ff   :  { %1473 = vmatmul.msk.f32.vlgmr.msrb.gmra.mxu3 %vm79_vm1, %v1931_v19  ;;  %v1236_v13 = vmul.f32 -1.0, %v1931_v19 }
 0x470   :  { %v1046_v21 = vpop.f32.mrf.mxu3 }
 0x471   :  { %v1050_v22 = vadd.f32 %v1049_v20, %v1046_v21 }
 0x473   :  { %v1052_v24 = vadd.f32 %v1051_v23, %v1050_v22 }
 0x475   :  { %v1466_v10 = vadd.f32 -1.0, %v1052_v24  ;;  %v1121_v26 = vmul.f32 0.95, %v1052_v24 }
 0x476   :  { %v1118_v27 = vpop.f32.mrf.mxu1 }
 0x477   :  { %vm1126_vm13 = vcmp.gt.f32.partialorder %v1466_v10, 0.0  ;;  %v1122_v30 = vadd.f32 %v1121_v26, %v1118_v27  ;;  %v1159_v32 = vpop.f32.mrf.mxu2 }
 0x478   :  { %v1467_v34 = vsel %vm1126_vm13, 1.0, %v1600_v11  ;;  %v1160_v35 = vadd.f32 %v1515_v25, %v1159_v32  ;;  %v1518_v25 = vld [vmem:[#allocation4 + $0x12] ss:$0 sm:$0xff] }
 0x479   :  { %v1130_v38 = vadd.f32 %v1467_v34, %v1129_v29  ;;  %v1124_v39 = vadd.f32 %v1123_v31, %v1122_v30  ;;  %v1195_v50 = vmul.f32 -1.0, %v1467_v34 }
 0x47a   :  { %v1163_v40 = vadd.f32 %v1162_v36, %v1160_v35 }
 0x47b   :  { %v1132_v28 = vadd.f32 %v1131_v18, %v1130_v38  ;;  %v1474_v41 = vadd.f32 -1.0, %v1124_v39  ;;  %v1193_v0 = vmul.f32 0.95, %v1124_v39 }
 0x47c   :  { %v1165_v43 = vadd.f32 %v1164_v37, %v1163_v40 }
 0x47d   :  { %vm1198_vm14 = vcmp.gt.f32.partialorder %v1474_v41, 0.0  ;;  %v1201_v44 = vmul.f32 0.95, %v1132_v28  ;;  %v1476_v2 = vadd.f32 -1.0, %v1132_v28 }
 0x47e   :  { %v1475_v45 = vsel %vm1198_vm14, 1.0, %v1600_v11  ;;  %v1479_v63 = vadd.f32 -1.0, %v1165_v43  ;;  %v1234_v9 = vmul.f32 0.95, %v1165_v43 }
 0x47f   :  { %v1202_v47 = vadd.f32 %v1475_v45, %v1201_v44  ;;  %vm1206_vm15 = vcmp.gt.f32.partialorder %v1476_v2, 0.0 }
 0x480   :  { %v1477_v48 = vsel %vm1206_vm15, 1.0, %v1600_v11  ;;  %vm1239_vm4 = vcmp.gt.f32.partialorder %v1479_v63, 0.0 }
 0x481   :  { %v1204_v4 = vadd.f32 %v1203_v46, %v1202_v47  ;;  %1478 = vmatmul.msk.f32.vlgmr.msra.gmra.mxu0 %vm79_vm1, %v1477_v48  ;;  %v1248_v42 = vmul.f32 -1.0, %v1477_v48  ;;  %v1480_v15 = vsel %vm1239_vm4, 1.0, %v1600_v11 }
 0x482   :  { %v1190_v49 = vpop.f32.mrf.mxu3  ;;  %v1281_v22 = vmul.f32 -1.0, %v1480_v15 }
 0x483   :  { %v1194_v7 = vadd.f32 %v1193_v0, %v1190_v49  ;;  %v1483_v51 = vadd.f32 -1.0, %v1204_v4  ;;  %v1246_v55 = vmul.f32 0.95, %v1204_v4 }
 0x485   :  { %v1196_v33 = vadd.f32 %v1195_v50, %v1194_v7  ;;  %vm1251_vm0 = vcmp.gt.f32.partialorder %v1483_v51, 0.0 }
 0x486   :  { %v1484_v53 = vsel %vm1251_vm0, 1.0, %v1600_v11 }
 0x487   :  { %v1481_v54 = vadd.f32 -1.0, %v1196_v33  ;;  %1485 = vmatmul.msk.f32.vlgmr.msra.gmra.mxu1 %vm79_vm1, %v1484_v53 }
 0x489   :  { %vm1243_vm2 = vcmp.gt.f32.partialorder %v1481_v54, 0.0 }
 0x48a   :  { %v1482_v56 = vsel %vm1243_vm2, 1.0, %v1600_v11 }
 0x48b   :  { %v1247_v57 = vadd.f32 %v1482_v56, %v1246_v55 }
 0x48d   :  { %v1249_v58 = vadd.f32 %v1248_v42, %v1247_v57 }
 0x48f   :  { %v1488_v59 = vadd.f32 -1.0, %v1249_v58 }
 0x491   :  { %vm1288_vm3 = vcmp.gt.f32.partialorder %v1488_v59, 0.0 }
 0x492   :  { %v1489_v60 = vsel %vm1288_vm3, 1.0, %v1600_v11 }
 0x493   :  { %1490 = vmatmul.msk.f32.vlgmr.msra.gmra.mxu2 %vm79_vm1, %v1489_v60 }
 0x4fe   :  { %v1231_v6 = vpop.f32.mrf.mxu0 }
 0x4ff   :  { %v1232_v5 = vadd.f32 %v1516_v1, %v1231_v6 }
 0x501   :  { %v1235_v12 = vadd.f32 %v1234_v9, %v1232_v5 }
 0x503   :  { %v1237_v61 = vadd.f32 %v1236_v13, %v1235_v12 }
 0x504   :  { %v1276_v16 = vpop.f32.mrf.mxu1 }
 0x505   :  { %v1277_v17 = vadd.f32 %v1517_v14, %v1276_v16  ;;  %v1279_v20 = vmul.f32 0.95, %v1237_v61  ;;  %v1486_v24 = vadd.f32 -1.0, %v1237_v61 }
 0x507   :  { %v1280_v21 = vadd.f32 %v1279_v20, %v1277_v17  ;;  %vm1284_vm5 = vcmp.gt.f32.partialorder %v1486_v24, 0.0 }
 0x508   :  { %v1487_v10 = vsel %vm1284_vm5, 1.0, %v1600_v11 }
 0x509   :  { %v1282_v23 = vadd.f32 %v1281_v22, %v1280_v21  ;;  %v1318_v30 = vmul.f32 -1.0, %v1487_v10 }
 0x50b   :  { %v1316_v29 = vmul.f32 0.95, %v1282_v23 }
 0x516   :  { %v1313_v26 = vpop.f32.mrf.mxu2 }
 0x517   :  { %v1314_v27 = vadd.f32 %v1518_v25, %v1313_v26 }
 0x519   :  { %v1317_v19 = vadd.f32 %v1316_v29, %v1314_v27 }
 0x51b   :  { %v1319_v31 = vadd.f32 %v1318_v30, %v1317_v19 }
 0x51d   :  { %v1491_v32 = vadd.f32 -1.0, %v1319_v31 }
 0x51f   :  { %vm1321_vm6 = vcmp.gt.f32.partialorder %v1491_v32, 0.0 }
 0x520   :  { %v1492_v34 = vsel %vm1321_vm6, 1.0, %v1600_v11 }
 0x521   :  { %1493 = vmatmul.msk.f32.vlgmr.msra.gmra.mxu3 %vm79_vm1, %v1492_v34 }
 0x5a4   :  { %v1348_v35 = vpop.f32.mrf.mxu3 }
 0x5a5   :  { %1352 = vst.msk [vmem:[%s1971_s5] sm:$0xff] %vm1351_vm7, %v1348_v35 }
 0x5a6   :  { %1357 = vsyncpa [#allocation3], 1 }
 0x5a7   :  { %1358 = vsyncpa [#allocation5], 1 }

</bundles_post_ra>
